<compile_context>
chip_gen: v6e
topology: v6e:2x2x1
jax: 0.10.0
libtpu: 0.0.40
codegen_flags: <defaults>
</compile_context>

<pallas_src>
import functools

import jax
import jax.numpy as jnp
from jax import lax
from jax.experimental import pallas as pl
from jax.experimental.pallas import tpu as pltpu


_INV_SQRT2 = 0.7071067811865476


# ---------------------------------------------------------------------------
# Fused MLP kernel:  out = gelu(x @ w1.T + b1) @ w2.T + b2
# (weights stay in PyTorch layout; hidden activation never leaves VMEM)
# ---------------------------------------------------------------------------
def _mlp_kernel(x_ref, w1_ref, b1_ref, w2_ref, b2_ref, o_ref):
    # x_ref:  (tile_m, C)
    # w1_ref: (H, C)      fc1 weight, PyTorch layout (contract on last dims)
    # b1_ref: (1, H)
    # w2_ref: (O, H)      fc2 weight, PyTorch layout
    # b2_ref: (1, O)
    # o_ref:  (tile_m, O)
    x = x_ref[...]

    # fc1: (tile_m, C) x (H, C) -> (tile_m, H), f32 accumulation on the MXU.
    h = lax.dot_general(
        x, w1_ref[...],
        dimension_numbers=(((1,), (1,)), ((), ())),
        preferred_element_type=jnp.float32)
    h = h + b1_ref[...].astype(jnp.float32)

    # Exact GELU (erf form) — matches nn.GELU() default (approximate='none').
    # Constants folded: one full-tile multiply saved vs 0.5*h*(1+erf(...)).
    h = h * (0.5 + 0.5 * lax.erf(h * _INV_SQRT2))

    # fc2: (tile_m, H) x (O, H) -> (tile_m, O).
    out = lax.dot_general(
        h.astype(w2_ref.dtype), w2_ref[...],
        dimension_numbers=(((1,), (1,)), ((), ())),
        preferred_element_type=jnp.float32)
    out = out + b2_ref[...].astype(jnp.float32)

    o_ref[...] = out.astype(o_ref.dtype)


def _round_up(v, m):
    return (v + m - 1) // m * m


def _min_sublane(dtype):
    # Minimum second-minor tile extent: 8 (f32), 16 (bf16), 32 (int8/fp8).
    itemsize = jnp.dtype(dtype).itemsize
    return max(8, 32 // max(itemsize, 1))


# ---------------------------------------------------------------------------
# Wrapper
# ---------------------------------------------------------------------------
def mlp_forward(x, params, *, use_bf16_matmul=False):
    """x: (..., in_features) -> (..., out_features)."""
    *lead, C = x.shape
    H, C_w = params["w1"].shape          # (hidden_features, in_features)
    O, H_w = params["w2"].shape          # (out_features, hidden_features)
    assert C_w == C and H_w == H

    orig_dtype = x.dtype
    x2 = x.reshape(-1, C)
    M = x2.shape[0]

    w1 = params["w1"]                    # (H, C)  — no transpose, no HBM copy
    w2 = params["w2"]                    # (O, H)
    b1 = params["b1"].reshape(1, H)
    b2 = params["b2"].reshape(1, O)

    if use_bf16_matmul:
        # MXU-native operands on all generations; accumulation stays f32
        # in-kernel via preferred_element_type.
        x2 = x2.astype(jnp.bfloat16)
        w1 = w1.astype(jnp.bfloat16)
        w2 = w2.astype(jnp.bfloat16)

    in_item = jnp.dtype(x2.dtype).itemsize
    w_item = jnp.dtype(w1.dtype).itemsize
    out_item = jnp.dtype(orig_dtype).itemsize

    # --- VMEM estimate / row-tile selection ---------------------------------
    # Weights + biases are grid-invariant and single-buffered; x / out tiles
    # are double-buffered; hidden activation is a (tile_m, H) f32 temporary.
    weight_bytes = (H * C + O * H + H + O) * w_item

    def est_bytes(tile_m):
        io_bytes = 2 * tile_m * (C * in_item + O * out_item)   # dbl-buffered
        act_bytes = 2 * tile_m * H * 4                         # h + gelu temp
        return weight_bytes + io_bytes + act_bytes

    budget = 40 * 1024 * 1024            # conservative across v5e/v6e/v7x
    min_m = _min_sublane(x2.dtype)

    if M < 128:
        tile_m = _round_up(max(M, 1), min_m)
    else:
        candidates = [t for t in (1024, 512, 256, 128) if est_bytes(t) <= budget]
        if not candidates:
            candidates = [128]
        # Prefer a tile that divides M (no pad/slice round trip) and leaves
        # >= 2 grid steps (both v7x TensorCores busy on the "parallel" axis).
        tile_m = next((t for t in candidates if M % t == 0 and M // t >= 2), None)
        if tile_m is None:
            tile_m = next((t for t in candidates if M % t == 0), None)
        if tile_m is None:
            tile_m = candidates[0]

    Mp = _round_up(M, tile_m)
    padded = Mp != M
    if padded:
        x2 = jnp.pad(x2, ((0, Mp - M), (0, 0)))

    # Scoped-VMEM limit with headroom, capped safely below v7x's 64 MiB.
    vmem_limit = int(min(max(est_bytes(tile_m) * 3 // 2 + (2 << 20),
                             16 * 1024 * 1024),
                         48 * 1024 * 1024))

    single_buf = pl.Buffered(1)          # grid-invariant operands
    in_specs = [
        pl.BlockSpec((tile_m, C), lambda i: (i, 0)),
        pl.BlockSpec((H, C), lambda i: (0, 0), pipeline_mode=single_buf),
        pl.BlockSpec((1, H), lambda i: (0, 0), pipeline_mode=single_buf),
        pl.BlockSpec((O, H), lambda i: (0, 0), pipeline_mode=single_buf),
        pl.BlockSpec((1, O), lambda i: (0, 0), pipeline_mode=single_buf),
    ]

    out = pl.pallas_call(
        _mlp_kernel,
        out_shape=jax.ShapeDtypeStruct((Mp, O), orig_dtype),
        grid_spec=pltpu.PrefetchScalarGridSpec(
            num_scalar_prefetch=0,
            grid=(Mp // tile_m,),
            in_specs=in_specs,
            out_specs=pl.BlockSpec((tile_m, O), lambda i: (i, 0)),
        ),
        compiler_params=pltpu.CompilerParams(
            dimension_semantics=("parallel",),
            vmem_limit_bytes=vmem_limit),
    )(x2, w1, b1, w2, b2)

    if padded:
        out = out[:M]
    return out.reshape(*lead, O)


# ---------------------------------------------------------------------------
# Pure-JAX reference (mirrors the PyTorch forward) for a sanity check
# ---------------------------------------------------------------------------
def mlp_reference(x, params):
    h = x @ params["w1"].T + params["b1"]
    h = 0.5 * h * (1.0 + lax.erf(h / jnp.sqrt(2.0).astype(h.dtype)))
    return h @ params["w2"].T + params["b2"]


if __name__ == "__main__":
    # Shapes consistent with a transformer-block Mlp:
    #   in_features = 128, hidden_features = 256 (mlp_ratio=2),
    #   out_features = in_features, tokens = B * N = 4 * 128 = 512.
    B, N = 4, 128
    in_features, hidden_features = 128, 256
    out_features = in_features

    key = jax.random.PRNGKey(0)
    k_x, k_w1, k_b1, k_w2, k_b2 = jax.random.split(key, 5)

    x = jax.random.normal(k_x, (B, N, in_features), dtype=jnp.float32)

    params = {
        # nn.Linear(in_features, hidden_features): weight (H, C), bias (H,)
        "w1": jax.random.normal(k_w1, (hidden_features, in_features),
                                dtype=jnp.float32) * 0.05,
        "b1": jax.random.normal(k_b1, (hidden_features,),
                                dtype=jnp.float32) * 0.05,
        # nn.Linear(hidden_features, out_features): weight (O, H), bias (O,)
        "w2": jax.random.normal(k_w2, (out_features, hidden_features),
                                dtype=jnp.float32) * 0.05,
        "b2": jax.random.normal(k_b2, (out_features,),
                                dtype=jnp.float32) * 0.05,
    }

    # Main f32 path (no pad, 2 grid steps of 256 rows).
    fwd = jax.jit(mlp_forward)
    y = fwd(x, params)
    jax.block_until_ready(y)
    y_ref = mlp_reference(x, params)
    assert y.shape == (B, N, out_features)
    assert jnp.allclose(y, y_ref, rtol=1e-4, atol=1e-4)

    # Small / ragged-M path (single grid step, wrapper-side pad fallback).
    x_small = jax.random.normal(k_x, (2, 10, in_features), dtype=jnp.float32)
    y_small = jax.jit(mlp_forward)(x_small, params)
    jax.block_until_ready(y_small)
    assert jnp.allclose(y_small, mlp_reference(x_small, params),
                        rtol=1e-4, atol=1e-4)

    # Optional bf16-MXU path, gated on a (looser) accuracy check.
    fwd_bf16 = jax.jit(functools.partial(mlp_forward, use_bf16_matmul=True))
    y_bf16 = fwd_bf16(x, params)
    jax.block_until_ready(y_bf16)
    assert jnp.allclose(y_bf16, y_ref, rtol=2e-2, atol=2e-2)

    print("KERNEL_OK")
</pallas_src>

<mosaic_0001>
module attributes {stable_mosaic.version = 11 : i64} {
  func.func @_mlp_kernel(%arg0: i32, %arg1: memref<256x128xf32, #tpu.memory_space<vmem>>, %arg2: memref<256x128xf32, #tpu.memory_space<vmem>>, %arg3: memref<1x256xf32, #tpu.memory_space<vmem>>, %arg4: memref<128x256xf32, #tpu.memory_space<vmem>>, %arg5: memref<1x128xf32, #tpu.memory_space<vmem>>, %arg6: memref<256x128xf32, #tpu.memory_space<vmem>>) attributes {dimension_semantics = [#tpu.dimension_semantics<parallel>], iteration_bounds = array<i64: 2>, scalar_prefetch = 0 : i64, scratch_operands = 0 : i64, tpu.core_type = #tpu.core_type<tc>, window_params = [{transform_indices = @transform_0, window_bounds = array<i64: 256, 128>}, {pipeline_mode = #tpu.pipeline_mode<synchronous>, transform_indices = @transform_1, window_bounds = array<i64: 256, 128>}, {pipeline_mode = #tpu.pipeline_mode<synchronous>, transform_indices = @transform_2, window_bounds = array<i64: 1, 256>}, {pipeline_mode = #tpu.pipeline_mode<synchronous>, transform_indices = @transform_3, window_bounds = array<i64: 128, 256>}, {pipeline_mode = #tpu.pipeline_mode<synchronous>, transform_indices = @transform_4, window_bounds = array<i64: 1, 128>}, {transform_indices = @transform_5, window_bounds = array<i64: 256, 128>}]} {
    %c0 = arith.constant 0 : index
    %c0_0 = arith.constant 0 : index
    %0 = vector.load %arg1[%c0, %c0_0] : memref<256x128xf32, #tpu.memory_space<vmem>>, vector<256x128xf32>
    %c0_1 = arith.constant 0 : index
    %c0_2 = arith.constant 0 : index
    %1 = vector.load %arg2[%c0_1, %c0_2] : memref<256x128xf32, #tpu.memory_space<vmem>>, vector<256x128xf32>
    %cst = arith.constant dense<0.000000e+00> : vector<256x256xf32>
    %2 = tpu.matmul %0, %1, %cst {dimension_numbers = #tpu.dot_dimension_numbers<[1], [1], [0], [0], [0, 0, 1, 0], [], []>} : vector<256x128xf32>, vector<256x128xf32>, vector<256x256xf32> -> vector<256x256xf32>
    %c0_3 = arith.constant 0 : index
    %c0_4 = arith.constant 0 : index
    %3 = vector.load %arg3[%c0_3, %c0_4] : memref<1x256xf32, #tpu.memory_space<vmem>>, vector<1x256xf32>
    %4 = vector.broadcast %3 : vector<1x256xf32> to vector<256x256xf32>
    %5 = arith.addf %2, %4 : vector<256x256xf32>
    %cst_5 = arith.constant 0.707106769 : f32
    %6 = vector.broadcast %cst_5 : f32 to vector<256x256xf32>
    %7 = arith.mulf %5, %6 : vector<256x256xf32>
    %8 = math.erf %7 : vector<256x256xf32>
    %cst_6 = arith.constant 5.000000e-01 : f32
    %9 = vector.broadcast %cst_6 : f32 to vector<256x256xf32>
    %10 = arith.mulf %9, %8 : vector<256x256xf32>
    %cst_7 = arith.constant 5.000000e-01 : f32
    %11 = vector.broadcast %cst_7 : f32 to vector<256x256xf32>
    %12 = arith.addf %11, %10 : vector<256x256xf32>
    %13 = arith.mulf %5, %12 : vector<256x256xf32>
    %c0_8 = arith.constant 0 : index
    %c0_9 = arith.constant 0 : index
    %14 = vector.load %arg4[%c0_8, %c0_9] : memref<128x256xf32, #tpu.memory_space<vmem>>, vector<128x256xf32>
    %cst_10 = arith.constant dense<0.000000e+00> : vector<256x128xf32>
    %15 = tpu.matmul %13, %14, %cst_10 {dimension_numbers = #tpu.dot_dimension_numbers<[1], [1], [0], [0], [0, 0, 1, 0], [], []>} : vector<256x256xf32>, vector<128x256xf32>, vector<256x128xf32> -> vector<256x128xf32>
    %c0_11 = arith.constant 0 : index
    %c0_12 = arith.constant 0 : index
    %16 = vector.load %arg5[%c0_11, %c0_12] : memref<1x128xf32, #tpu.memory_space<vmem>>, vector<1x128xf32>
    %17 = vector.broadcast %16 : vector<1x128xf32> to vector<256x128xf32>
    %18 = arith.addf %15, %17 : vector<256x128xf32>
    %c0_13 = arith.constant 0 : index
    %c0_14 = arith.constant 0 : index
    %19 = vector.load %arg6[%c0_13, %c0_14] : memref<256x128xf32, #tpu.memory_space<vmem>>, vector<256x128xf32>
    tpu.vector_store %arg6[%c0_13, %c0_14], %18 {strides = array<i32>} : memref<256x128xf32, #tpu.memory_space<vmem>>, vector<256x128xf32>,
    return
  }
  func.func @transform_0(%arg0: i32) -> (i32, i32) {
    %c0_i32 = arith.constant 0 : i32
    %c0_i32_0 = arith.constant 0 : i32
    return %arg0, %c0_i32 : i32, i32
  }
  func.func @transform_1(%arg0: i32) -> (i32, i32) {
    %c0_i32 = arith.constant 0 : i32
    %c0_i32_0 = arith.constant 0 : i32
    %c0_i32_1 = arith.constant 0 : i32
    return %c0_i32, %c0_i32_0 : i32, i32
  }
  func.func @transform_2(%arg0: i32) -> (i32, i32) {
    %c0_i32 = arith.constant 0 : i32
    %c0_i32_0 = arith.constant 0 : i32
    %c0_i32_1 = arith.constant 0 : i32
    return %c0_i32, %c0_i32_0 : i32, i32
  }
  func.func @transform_3(%arg0: i32) -> (i32, i32) {
    %c0_i32 = arith.constant 0 : i32
    %c0_i32_0 = arith.constant 0 : i32
    %c0_i32_1 = arith.constant 0 : i32
    return %c0_i32, %c0_i32_0 : i32, i32
  }
  func.func @transform_4(%arg0: i32) -> (i32, i32) {
    %c0_i32 = arith.constant 0 : i32
    %c0_i32_0 = arith.constant 0 : i32
    %c0_i32_1 = arith.constant 0 : i32
    return %c0_i32, %c0_i32_0 : i32, i32
  }
  func.func @transform_5(%arg0: i32) -> (i32, i32) {
    %c0_i32 = arith.constant 0 : i32
    %c0_i32_0 = arith.constant 0 : i32
    return %arg0, %c0_i32 : i32, i32
  }
}

</mosaic_0001>

<bundles_post_ra>
// kernel: mlp_forward.1
= control target key start
LH: loop header
LB: loop body
LE: loop exit
PB: predicated region body
PF: predicated region fallthrough
CT: control target
= control target key end

     0   :  { %10 = vsyncpa [#allocation3], 0  ;;  %s2452_s0 = inlined_call_operand.hbm [shape: f32[512,128], index: 0, kind: input, shape index: {}]   ;;  %s2453_s1 = inlined_call_operand.hbm [shape: f32[256,128], index: 1, kind: input, shape index: {}]   ;;  %s2454_s2 = inlined_call_operand.vmem [shape: f32[1,256], index: 2, kind: input, shape index: {}]   ;;  %s2455_s3 = inlined_call_operand.hbm [shape: f32[128,256], index: 3, kind: input, shape index: {}]   ;;  %s2456_s4 = inlined_call_operand.vmem [shape: f32[1,128], index: 4, kind: input, shape index: {}]   ;;  %s2457_s5 = inlined_call_operand.hbm [shape: f32[512,128], index: 5, kind: output, shape index: {}]  }
   0x1   :  { %12 = vsyncpa [#allocation3 + $0x1], 0 }
   0x2   :  { %13 = vsyncpa [#allocation6], 0 }
   0x3   :  { %14 = vsyncpa [#allocation4], 0 }
   0x4   :  { %16 = vsyncpa [#allocation4 + $0x1], 0  ;;  %s1837_s18 = smov 0   ;;  %s1839_s19 = smov 0  }
   0x5   :  { %s1841_s20 = smov 0   ;;  %s1843_s21 = smov 0  }
   0x6 LB: > { %s1858_s22 = sadd.s32 4294967295, %s1795_s21   ;;  %s1329_s23 = sadd.s32 4294967294, %s1795_s21   ;;  %s1795_s21 = sphi %s1843_s21, %s2480_s21   ;;  %s1791_s20 = sphi %s1841_s20, %s2479_s20   ;;  %s1787_s19 = sphi %s1839_s19, %s2478_s19   ;;  %s1783_s18 = sphi %s1837_s18, %s2477_s18  }
   0x7   : > { %p42_p0 = scmp.ne.s32.totalorder %s1787_s19, %s1783_s18  ;;  %p2458_p1 = scmp.eq.s32.totalorder %s1858_s22, 0 }
   0x8   : > { %p150_p2 = scmp.eq.s32.totalorder %s1858_s22, 1  ;;  %p156_p3 = scmp.eq.s32.totalorder %s1329_s23, 1 }
   0x9   : > { %p1867_p4 = por %p2458_p1, %p42_p0  ;;  %p1330_p5 = scmp.ge.s32.totalorder %s1795_s21, 1 }
   0xa   : > { %p1872_p6 = por %p156_p3, %p42_p0  ;;  %p163_p7 = scmp.lt.s32.totalorder %s1795_s21, 3 }
   0xb   : > { %s2463_s24 = scalar_select %p1867_p4, 1, 0 }
   0xc   : > { %s2464_s25 = scalar_select %p1872_p6, 1, 0 }
   0xd   : > { %p1877_p8 = pnand %p1330_p5, %p163_p7  ;;  %s1797_s27 = smov [#allocation5]  }
   0xe   : > { %s175_s28 = sshll.u32 %s1797_s27, 4  ;;  %s1798_s30 = smov [#allocation7]   ;;  %s176_s28 = int_to_ptr.vmem [resolvable:$true] %s175_s28 }
   0xf   : > { %s2465_s26 = scalar_select %p1877_p8, 1, 0 }
  0x10   : > { %p1458_p9 = pneg %p1877_p8  ;;  %s191_s6 = sshll.u32 %s1798_s30, 4  ;;  %s192_s6 = int_to_ptr.vmem [resolvable:$true] %s191_s6 }
  0x11   : > { %s1658_s7 = scalar_lea.vmem %s176_s28, 4096  ;;  %p1666_p5 = scmp.lt.s32.totalorder %s176_s28, %s176_s28 }
  0x12   : > { %p1886_p11 = pnand %p1458_p9, %p2458_p1  ;;  %p1659_p13 = scmp.ne.s32.totalorder %s176_s28, %s1658_s7 }
  0x13   : > { %p1667_p7 = scmp.lt.s32.totalorder %s1658_s7, %s1658_s7 }
  0x14   : > { %p1649_p12 = pneg %p1886_p11 }
  0x15   : > { %p1668_p10 = por %p1667_p7, %p1666_p5 }
  0x16   : > { %p1661_p0 = pnand %p1659_p13, %p1649_p12 }
  0x18   : > { %p1662_p3 = pneg %p1661_p0 }
  0x1a   : > { %p1669_p9 = pnand %p1668_p10, %p1662_p3 }
  0x1c   : > { %1672 = shalt.err (!%p1669_p9)
}
  0x1d   : > { %s2459_s8 = smov 128   ;;  %s1800_s9 = smov 8  }
  0x1e   : > { %1461 = dma.hbm_to_vmem [thread:$0]  (!%p1886_p11), %s2453_s1, 4096, %s176_s28, [#allocation6], %s2459_s8, %s2459_s8, %s1800_s9  }
  0x1f   : > { %s1684_s12 = scalar_lea.vmem %s192_s6, 4096  ;;  %p1692_p10 = scmp.lt.s32.totalorder %s192_s6, %s192_s6 }
  0x20   : > { %p1685_p13 = scmp.ne.s32.totalorder %s192_s6, %s1684_s12  ;;  %p1693_p3 = scmp.lt.s32.totalorder %s1684_s12, %s1684_s12 }
  0x22   : > { %p1687_p0 = pnand %p1685_p13, %p1649_p12  ;;  %p1694_p7 = por %p1693_p3, %p1692_p10 }
  0x24   : > { %p1688_p5 = pneg %p1687_p0 }
  0x26   : > { %p1695_p9 = pnand %p1694_p7, %p1688_p5 }
  0x28   : > { %1698 = shalt.err (!%p1695_p9)
}
  0x29   : > { %s1801_s13 = smov 256   ;;  %s1802_s14 = smov 16  }
  0x2a   : > { %1464 = dma.hbm_to_vmem [thread:$0]  (!%p1886_p11), %s2455_s3, 4096, %s192_s6, [#allocation6], %s1801_s13, %s1801_s13, %s1802_s14  }
  0x2b   : > { %s1912_s17 = sadd.s32 1, %s1795_s21   ;;  %s29_s27 = sadd.s32 1, %s1791_s20 }
  0x2c   : > { %s26_s23 = ssub.s32 %s1795_s21, %s1912_s17  ;;  %p36_p13 = scmp.ne.s32.totalorder %s1791_s20, %s1787_s19 }
  0x2d   : > { %p27_p12 = scmp.eq.s32.totalorder %s26_s23, 0  ;;  %p37_p0 = scmp.eq.s32.totalorder %s1795_s21, 0 }
  0x2e   : > { %p1925_p10 = por %p150_p2, %p36_p13  ;;  %p1475_p3 = scmp.lt.s32.totalorder %s1795_s21, 2 }
  0x2f   : > { %s1921_s28 = scalar_select %p27_p12, %s1791_s20, %s29_s27  }
  0x30   : > { %p38_p5 = por %p37_p0, %p36_p13  ;;  %s208_s29 = sand.u32 1, %s1791_s20  }
  0x31   : > { %s2467_s30 = scalar_select %p1925_p10, 1, 0 }
  0x32   : > { %s1334_s7 = sshll.u32 %s208_s29, 8  ;;  %s1348_s6 = sshll.u32 %s1795_s21, 12 }
  0x33   : > { %s1935_s12 = scalar_lea.hbm %s2452_s0, %s1348_s6  ;;  %s212_s13 = scalar_lea.vmem [#allocation2], %s1334_s7 }
  0x34   : > { %s219_s14 = sshll.u32 %s212_s13, 4  ;;  %p1939_p2 = pnand %p1475_p3, %p38_p5  ;;  %s1937_s14 = int_to_ptr.vmem [resolvable:$true] %s219_s14 }
  0x35   : > { %s1943_s16 = scalar_lea.sflag [#allocation3], %s208_s29  ;;  %s1699_s23 = scalar_lea.hbm %s1935_s12, 4096 }
  0x36   : > { %p1700_p11 = scmp.ne.s32.totalorder %s1935_s12, %s1699_s23  ;;  %p1701_p7 = pneg %p1939_p2 }
  0x37   : > { %s1704_s7 = scalar_lea.hbm %s2452_s0, 8192  ;;  %p1705_p13 = scmp.lt.s32.totalorder %s1935_s12, %s2452_s0 }
  0x38   : > { %p1702_p9 = pnand %p1701_p7, %p1700_p11  ;;  %p1706_p0 = scmp.lt.s32.totalorder %s1704_s7, %s1699_s23 }
  0x3a   : > { %p1703_p12 = pneg %p1702_p9  ;;  %p1707_p5 = por %p1706_p0, %p1705_p13 }
  0x3c   : > { %p1708_p3 = pnand %p1707_p5, %p1703_p12 }
  0x3e   : > { %1711 = shalt.err (!%p1708_p3)
}
  0x3f   : > { %s1712_s29 = scalar_lea.vmem %s1937_s14, 4096  ;;  %s1803_s13 = smov [#allocation2]  }
  0x40   : > { %p1713_p1 = scmp.ne.s32.totalorder %s1937_s14, %s1712_s29  ;;  %s1717_s8 = sshll.u32 %s1803_s13, 4  ;;  %s1718_s8 = int_to_ptr.vmem [resolvable:$false] %s1717_s8 }
  0x41   : > { %s1719_s27 = scalar_lea.vmem %s1718_s8, 8192  ;;  %p1720_p9 = scmp.lt.s32.totalorder %s1937_s14, %s1718_s8 }
  0x42   : > { %p1715_p6 = pnand %p1713_p1, %p1701_p7  ;;  %p1721_p10 = scmp.lt.s32.totalorder %s1719_s27, %s1712_s29 }
  0x44   : > { %p1716_p11 = pneg %p1715_p6  ;;  %p1722_p4 = por %p1721_p10, %p1720_p9 }
  0x46   : > { %p1723_p8 = pnand %p1722_p4, %p1716_p11 }
  0x48   : > { %1726 = shalt.err (!%p1723_p8)
}
  0x49   : > { %s2469_s23 = smov 128   ;;  %p2470_p1 = scmp.ne.s32.totalorder %s2465_s26, 0 }
  0x4a   : > { %1468 = dma.hbm_to_vmem [thread:$0]  (!%p1939_p2), %s1935_s12, 4096, %s1937_s14, %s1943_s16, %s2469_s23, %s2469_s23, %s1800_s9  }
  0x4b   : > { %231 = sbr.rel (%p2470_p1) target bundleno = 703 (0x2bf), region = 40  ;;  %s1970_s6 = sand.u32 (!%p2470_p1), 1, %s1787_s19  }
  0x4c   : > { %s1338_s8 = sshll.u32 (!%p2470_p1), %s1970_s6, 8  ;;  %s234_s7 = scalar_lea.sflag (!%p2470_p1), [#allocation3], %s1970_s6 }
  0x4d   : > { %s1976_s15 = scalar_lea.vmem (!%p2470_p1), [#allocation2], %s1338_s8  ;;  %p2471_p4 = scmp.ne.s32.totalorder (!%p2470_p1), %s2463_s24, 0 }
  0x50   : > { %1770 = dma.done.wait (%p2471_p4), %s234_s7, 4096  }
  0x51   : > { %1772 = vsyncadd (%p2471_p4), %s234_s7, 4294963200  ;;  %p2472_p6 = scmp.eq.s32.totalorder %s1858_s22, 0 }
  0x53   : > { %1774 = dma.done.wait (%p2472_p6), [#allocation6], 8192   ;;  %p2473_p8 = pmov %p2472_p6 }
  0x54   : > { %v337_v0 = vld [vmem:[#allocation5 + $0xf8] sm:$0xff]  ;;  %v336_v2 = vld [vmem:[#allocation5 + $0xf0] sm:$0xff]  ;;  %v335_v4 = vld [vmem:[#allocation5 + $0xe8] sm:$0xff]  ;;  %s2337_s14 = scalar_lea.vmem [#allocation8], %s1338_s8  ;;  %s1349_s16 = sshll.u32 %s1858_s22, 12 }
  0x55   : > { %1776 = vsyncadd (%p2473_p8), [#allocation6], 4294959104  ;;  %v321_v1 = vld [vmem:[#allocation5 + $0x78] sm:$0xff]  ;;  %1350 = vmatprep.subr.mxu0 %v337_v0  ;;  %v320_v3 = vld [vmem:[#allocation5 + $0x70] sm:$0xff]  ;;  %s1237_s10 = sshll.u32 %s2337_s14, 4  ;;  %s2405_s13 = scalar_lea.hbm %s2457_s5, %s1349_s16  ;;  %s2407_s10 = int_to_ptr.vmem [resolvable:$true] %s1237_s10 }
  0x56   : > { %1351 = vmatpush3.xpose.msra.mxu0 %v321_v1  ;;  %v319_v5 = vld [vmem:[#allocation5 + $0x68] sm:$0xff]  ;;  %v334_v6 = vld [vmem:[#allocation5 + $0xe0] sm:$0xff]  ;;  %v333_v9 = vld [vmem:[#allocation5 + $0xd8] sm:$0xff]  ;;  %s1224_s27 = scalar_lea.sflag [#allocation4], %s1970_s6  ;;  %s1727_s22 = scalar_lea.vmem %s2407_s10, 4096 }
  0x57   : > { %1352 = vmatprep.subr.mxu0 %v336_v2  ;;  %v274_v7 = vld [vmem:[%s1976_s15] sm:$0xff]  ;;  %v317_v10 = vld [vmem:[#allocation5 + $0x58] sm:$0xff]  ;;  %v332_v11 = vld [vmem:[#allocation5 + $0xd0] sm:$0xff]  ;;  %p1728_p10 = scmp.ne.s32.totalorder %s2407_s10, %s1727_s22  ;;  %p2474_p2 = scmp.ne.s32.totalorder %s2467_s30, 0 }
  0x58   : > { %v318_v8 = vld [vmem:[#allocation5 + $0x60] sm:$0xff]  ;;  %1382 = vmatprep.mubr.f32.mxu0 %v274_v7  ;;  %v316_v12 = vld [vmem:[#allocation5 + $0x50] sm:$0xff]  ;;  %v331_v13 = vld [vmem:[#allocation5 + $0xc8] sm:$0xff]  ;;  %s1804_s23 = smov [#allocation8]  }
  0x59   : > { %v315_v14 = vld [vmem:[#allocation5 + $0x48] sm:$0xff]  ;;  %v330_v15 = vld [vmem:[#allocation5 + $0xc0] sm:$0xff]  ;;  %v329_v17 = vld [vmem:[#allocation5 + $0xb8] sm:$0xff]  ;;  %p1729_p7 = pnand %p1728_p10, %p2474_p2  ;;  %s1731_s8 = sshll.u32 %s1804_s23, 4  ;;  %s1732_s8 = int_to_ptr.vmem [resolvable:$false] %s1731_s8 }
  0x5a   : > { %1353 = vmatpush3.xpose.msra.mxu0 %v320_v3  ;;  %v314_v16 = vld [vmem:[#allocation5 + $0x40] sm:$0xff]  ;;  %v313_v18 = vld [vmem:[#allocation5 + $0x38] sm:$0xff]  ;;  %v328_v19 = vld [vmem:[#allocation5 + $0xb0] sm:$0xff]  ;;  %s1733_s7 = scalar_lea.vmem %s1732_s8, 8192  ;;  %p1734_p13 = scmp.lt.s32.totalorder %s2407_s10, %s1732_s8 }
  0x5b   : > { %1354 = vmatprep.subr.mxu0 %v335_v4  ;;  %v312_v20 = vld [vmem:[#allocation5 + $0x30] sm:$0xff]  ;;  %v327_v21 = vld [vmem:[#allocation5 + $0xa8] sm:$0xff]  ;;  %v326_v23 = vld [vmem:[#allocation5 + $0xa0] sm:$0xff]  ;;  %p1730_p12 = pneg %p1729_p7  ;;  %p1735_p0 = scmp.lt.s32.totalorder %s1733_s7, %s1727_s22 }
  0x5c   : > { %v311_v22 = vld [vmem:[#allocation5 + $0x28] sm:$0xff]  ;;  %v310_v24 = vld [vmem:[#allocation5 + $0x20] sm:$0xff]  ;;  %v325_v25 = vld [vmem:[#allocation5 + $0x98] sm:$0xff] }
  0x5d   : > { %v309_v26 = vld [vmem:[#allocation5 + $0x18] sm:$0xff]  ;;  %v324_v27 = vld [vmem:[#allocation5 + $0x90] sm:$0xff]  ;;  %v323_v29 = vld [vmem:[#allocation5 + $0x88] sm:$0xff]  ;;  %p1736_p5 = por %p1735_p0, %p1734_p13 }
  0x5e   : > { %1355 = vmatpush3.xpose.msra.mxu0 %v319_v5  ;;  %v308_v28 = vld [vmem:[#allocation5 + $0x10] sm:$0xff]  ;;  %v307_v30 = vld [vmem:[#allocation5 + $0x8] sm:$0xff]  ;;  %v322_v31 = vld [vmem:[#allocation5 + $0x80] sm:$0xff] }
  0x5f   : > { %1356 = vmatprep.subr.mxu0 %v334_v6  ;;  %v306_v32 = vld [vmem:[#allocation5] sm:$0xff]  ;;  %v958_v33 = vld [vmem:[#allocation7 + $0xf8] sm:$0xff]  ;;  %v957_v34 = vld [vmem:[#allocation7 + $0xf0] sm:$0xff]  ;;  %p1737_p3 = pnand %p1736_p5, %p1730_p12 }
  0x60   : > { %v956_v35 = vld [vmem:[#allocation7 + $0xe8] sm:$0xff]  ;;  %966 = vmatprep.subr.mxu1 %v958_v33  ;;  %v955_v37 = vld [vmem:[#allocation7 + $0xe0] sm:$0xff]  ;;  %v954_v38 = vld [vmem:[#allocation7 + $0xd8] sm:$0xff] }
  0x61   : > { %v275_v36 = vld [vmem:[%s1976_s15 + $0x8] sm:$0xff]  ;;  %967 = vmatpush1.xpose.msra.mxu1 %v957_v34  ;;  %v276_v39 = vld [vmem:[%s1976_s15 + $0x10] sm:$0xff]  ;;  %v277_v42 = vld [vmem:[%s1976_s15 + $0x18] sm:$0xff] }
  0x62   : > { %1357 = vmatpush3.xpose.msra.mxu0 %v318_v8  ;;  %968 = vmatprep.subr.mxu1 %v956_v35  ;;  %v953_v40 = vld [vmem:[#allocation7 + $0xd0] sm:$0xff]  ;;  %v952_v41 = vld [vmem:[#allocation7 + $0xc8] sm:$0xff]  ;;  %v951_v43 = vld [vmem:[#allocation7 + $0xc0] sm:$0xff] }
  0x63   : > { %1358 = vmatprep.subr.mxu0 %v333_v9  ;;  %v950_v44 = vld [vmem:[#allocation7 + $0xb8] sm:$0xff]  ;;  %v278_v45 = vld [vmem:[%s1976_s15 + $0x20] sm:$0xff]  ;;  %v949_v46 = vld [vmem:[#allocation7 + $0xb0] sm:$0xff] }
  0x64   : > { %v948_v47 = vld [vmem:[#allocation7 + $0xa8] sm:$0xff]  ;;  %v947_v49 = vld [vmem:[#allocation7 + $0xa0] sm:$0xff]  ;;  %v946_v50 = vld [vmem:[#allocation7 + $0x98] sm:$0xff] }
  0x65   : > { %969 = vmatpush1.xpose.msra.mxu1 %v955_v37  ;;  %v279_v48 = vld [vmem:[%s1976_s15 + $0x28] sm:$0xff]  ;;  %v280_v51 = vld [vmem:[%s1976_s15 + $0x30] sm:$0xff]  ;;  %v281_v54 = vld [vmem:[%s1976_s15 + $0x38] sm:$0xff] }
  0x66   : > { %1359 = vmatpush3.xpose.msra.mxu0 %v317_v10  ;;  %970 = vmatprep.subr.mxu1 %v954_v38  ;;  %v945_v52 = vld [vmem:[#allocation7 + $0x90] sm:$0xff]  ;;  %v944_v53 = vld [vmem:[#allocation7 + $0x88] sm:$0xff]  ;;  %v943_v55 = vld [vmem:[#allocation7 + $0x80] sm:$0xff] }
  0x67   : > { %1360 = vmatprep.subr.mxu0 %v332_v11  ;;  %v942_v56 = vld [vmem:[#allocation7 + $0x78] sm:$0xff]  ;;  %v282_v57 = vld [vmem:[%s1976_s15 + $0x40] sm:$0xff]  ;;  %v941_v58 = vld [vmem:[#allocation7 + $0x70] sm:$0xff] }
  0x68   : > { %v283_v59 = vld [vmem:[%s1976_s15 + $0x48] sm:$0xff]  ;;  %v284_v60 = vld [vmem:[%s1976_s15 + $0x50] sm:$0xff]  ;;  %v285_v61 = vld [vmem:[%s1976_s15 + $0x58] sm:$0xff] }
  0x69   : > { %971 = vmatpush1.xpose.msra.mxu1 %v953_v40  ;;  %v286_v62 = vld [vmem:[%s1976_s15 + $0x60] sm:$0xff]  ;;  %v287_v63 = vld [vmem:[%s1976_s15 + $0x68] sm:$0xff]  ;;  %v288_v0 = vld [vmem:[%s1976_s15 + $0x70] sm:$0xff] }
  0x6a   : > { %1361 = vmatpush3.xpose.msra.mxu0 %v316_v12  ;;  %972 = vmatprep.subr.mxu1 %v952_v41  ;;  %v289_v1 = vld [vmem:[%s1976_s15 + $0x78] sm:$0xff]  ;;  %v290_v2 = vld [vmem:[%s1976_s15 + $0x80] sm:$0xff]  ;;  %v291_v3 = vld [vmem:[%s1976_s15 + $0x88] sm:$0xff] }
  0x6b   : > { %1362 = vmatprep.subr.mxu0 %v331_v13  ;;  %v940_v4 = vld [vmem:[#allocation7 + $0x68] sm:$0xff]  ;;  %v939_v5 = vld [vmem:[#allocation7 + $0x60] sm:$0xff]  ;;  %v292_v6 = vld [vmem:[%s1976_s15 + $0x90] sm:$0xff] }
  0x6c   : > { %v937_v8 = vld [vmem:[#allocation7 + $0x50] sm:$0xff]  ;;  %v293_v9 = vld [vmem:[%s1976_s15 + $0x98] sm:$0xff]  ;;  %v936_v10 = vld [vmem:[#allocation7 + $0x48] sm:$0xff] }
  0x6d   : > { %973 = vmatpush1.xpose.msra.mxu1 %v951_v43  ;;  %v935_v11 = vld [vmem:[#allocation7 + $0x40] sm:$0xff]  ;;  %v934_v13 = vld [vmem:[#allocation7 + $0x38] sm:$0xff] }
  0x6e   : > { %1363 = vmatpush3.xpose.msra.mxu0 %v315_v14  ;;  %974 = vmatprep.subr.mxu1 %v950_v44  ;;  %v294_v12 = vld [vmem:[%s1976_s15 + $0xa0] sm:$0xff]  ;;  %v933_v14 = vld [vmem:[#allocation7 + $0x30] sm:$0xff] }
  0x6f   : > { %1364 = vmatprep.subr.mxu0 %v330_v15  ;;  %v295_v15 = vld [vmem:[%s1976_s15 + $0xa8] sm:$0xff]  ;;  %v338_v35 = vld [vmem:[%s2454_s2] sm:$0x3] }
  0x71   : > { %975 = vmatpush1.xpose.msra.mxu1 %v949_v46 }
  0x72   : > { %1365 = vmatpush3.xpose.msra.mxu0 %v314_v16  ;;  %976 = vmatprep.subr.mxu1 %v948_v47  ;;  %v932_v16 = vld [vmem:[#allocation7 + $0x28] sm:$0xff] }
  0x73   : > { %1366 = vmatprep.subr.mxu0 %v329_v17  ;;  %v931_v17 = vld [vmem:[#allocation7 + $0x20] sm:$0xff] }
  0x75   : > { %977 = vmatpush1.xpose.msra.mxu1 %v947_v49 }
  0x76   : > { %1367 = vmatpush3.xpose.msra.mxu0 %v313_v18  ;;  %978 = vmatprep.subr.mxu1 %v946_v50  ;;  %v296_v18 = vld [vmem:[%s1976_s15 + $0xb0] sm:$0xff] }
  0x77   : > { %1368 = vmatprep.subr.mxu0 %v328_v19  ;;  %v930_v19 = vld [vmem:[#allocation7 + $0x18] sm:$0xff] }
  0x79   : > { %979 = vmatpush1.xpose.msra.mxu1 %v945_v52 }
  0x7a   : > { %1369 = vmatpush3.xpose.msra.mxu0 %v312_v20  ;;  %980 = vmatprep.subr.mxu1 %v944_v53  ;;  %v929_v20 = vld [vmem:[#allocation7 + $0x10] sm:$0xff] }
  0x7b   : > { %1370 = vmatprep.subr.mxu0 %v327_v21  ;;  %v297_v21 = vld [vmem:[%s1976_s15 + $0xb8] sm:$0xff] }
  0x7d   : > { %981 = vmatpush1.xpose.msra.mxu1 %v943_v55 }
  0x7e   : > { %1371 = vmatpush3.xpose.msra.mxu0 %v311_v22  ;;  %982 = vmatprep.subr.mxu1 %v942_v56  ;;  %v928_v22 = vld [vmem:[#allocation7 + $0x8] sm:$0xff] }
  0x7f   : > { %1372 = vmatprep.subr.mxu0 %v326_v23  ;;  %v927_v23 = vld [vmem:[#allocation7] sm:$0xff] }
  0x81   : > { %983 = vmatpush1.xpose.msra.mxu1 %v941_v58 }
  0x82   : > { %1373 = vmatpush3.xpose.msra.mxu0 %v310_v24  ;;  %984 = vmatprep.subr.mxu1 %v940_v4  ;;  %v298_v24 = vld [vmem:[%s1976_s15 + $0xc0] sm:$0xff] }
  0x83   : > { %1374 = vmatprep.subr.mxu0 %v325_v25  ;;  %v299_v25 = vld [vmem:[%s1976_s15 + $0xc8] sm:$0xff] }
  0x85   : > { %985 = vmatpush1.xpose.msra.mxu1 %v939_v5 }
  0x86   : > { %1375 = vmatpush3.xpose.msra.mxu0 %v309_v26  ;;  %v300_v26 = vld [vmem:[%s1976_s15 + $0xd0] sm:$0xff] }
  0x87   : > { %1376 = vmatprep.subr.mxu0 %v324_v27  ;;  %v301_v27 = vld [vmem:[%s1976_s15 + $0xd8] sm:$0xff] }
  0x8a   : > { %1377 = vmatpush3.xpose.msra.mxu0 %v308_v28  ;;  %v302_v28 = vld [vmem:[%s1976_s15 + $0xe0] sm:$0xff] }
  0x8b   : > { %1378 = vmatprep.subr.mxu0 %v323_v29  ;;  %v303_v29 = vld [vmem:[%s1976_s15 + $0xe8] sm:$0xff] }
  0x8e   : > { %1379 = vmatpush3.xpose.msra.mxu0 %v307_v30  ;;  %v304_v30 = vld [vmem:[%s1976_s15 + $0xf0] sm:$0xff] }
  0x8f   : > { %1380 = vmatprep.subr.mxu0 %v322_v31  ;;  %v305_v31 = vld [vmem:[%s1976_s15 + $0xf8] sm:$0xff] }
  0x92   : > { %1381 = vmatpush3.xpose.msra.mxu0 %v306_v32  ;;  %v340_v32 = vlaneseq }
  0x94   : > { %v341_v33 = vshrl.u32 %v340_v32, 7 }
  0x95   : > { %1383 = vmatmul.mubr.f32.vlgmr.msra.gmra.mxu0 %v274_v7  ;;  %v938_v7 = vld [vmem:[#allocation7 + $0x58] sm:$0xff] }
  0x96   : > { %1384 = vmatprep.mubr.f32.mxu0 %v275_v36  ;;  %986 = vmatprep.subr.mxu1 %v938_v7  ;;  %v342_v34 = vsub.s32 0, %v341_v33 }
  0x97   : > { %987 = vmatpush1.xpose.msra.mxu1 %v937_v8 }
  0x98   : > { %988 = vmatprep.subr.mxu1 %v936_v10  ;;  %v2021_v37 = vrot.slane %v338_v35, %v342_v34 }
  0x99   : > { %1385 = vmatmul.mubr.f32.gmra.mxu0 %v275_v36  ;;  %v346_v36 = vsub.s32 1, %v341_v33 }
  0x9a   : > { %1386 = vmatprep.mubr.f32.mxu0 %v276_v39 }
  0x9b   : > { %989 = vmatpush1.xpose.msra.mxu1 %v935_v11  ;;  %v2023_v38 = vrot.slane %v338_v35, %v346_v36 }
  0x9c   : > { %990 = vmatprep.subr.mxu1 %v934_v13 }
  0x9d   : > { %1387 = vmatmul.mubr.f32.gmra.mxu0 %v276_v39 }
  0x9e   : > { %1388 = vmatprep.mubr.f32.mxu0 %v277_v42 }
  0x9f   : > { %991 = vmatpush1.xpose.msra.mxu1 %v933_v14 }
  0xa0   : > { %992 = vmatprep.subr.mxu1 %v932_v16 }
  0xa1   : > { %1389 = vmatmul.mubr.f32.gmra.mxu0 %v277_v42 }
  0xa2   : > { %1390 = vmatprep.mubr.f32.mxu0 %v278_v45 }
  0xa3   : > { %993 = vmatpush1.xpose.msra.mxu1 %v931_v17 }
  0xa4   : > { %994 = vmatprep.subr.mxu1 %v930_v19 }
  0xa5   : > { %1391 = vmatmul.mubr.f32.gmra.mxu0 %v278_v45 }
  0xa6   : > { %1392 = vmatprep.mubr.f32.mxu0 %v279_v48 }
  0xa7   : > { %995 = vmatpush1.xpose.msra.mxu1 %v929_v20 }
  0xa8   : > { %996 = vmatprep.subr.mxu1 %v928_v22 }
  0xa9   : > { %1393 = vmatmul.mubr.f32.gmra.mxu0 %v279_v48 }
  0xaa   : > { %1394 = vmatprep.mubr.f32.mxu0 %v280_v51 }
  0xab   : > { %997 = vmatpush1.xpose.msra.mxu1 %v927_v23 }
  0xad   : > { %1395 = vmatmul.mubr.f32.gmra.mxu0 %v280_v51 }
  0xae   : > { %1396 = vmatprep.mubr.f32.mxu0 %v281_v54 }
  0xb1   : > { %1397 = vmatmul.mubr.f32.gmra.mxu0 %v281_v54 }
  0xb2   : > { %1398 = vmatprep.mubr.f32.mxu0 %v282_v57 }
  0xb5   : > { %1399 = vmatmul.mubr.f32.gmra.mxu0 %v282_v57 }
  0xb6   : > { %1400 = vmatprep.mubr.f32.mxu0 %v283_v59 }
  0xb9   : > { %1401 = vmatmul.mubr.f32.gmra.mxu0 %v283_v59 }
  0xba   : > { %1402 = vmatprep.mubr.f32.mxu0 %v284_v60 }
  0xbd   : > { %1403 = vmatmul.mubr.f32.gmra.mxu0 %v284_v60 }
  0xbe   : > { %1404 = vmatprep.mubr.f32.mxu0 %v285_v61 }
  0xc1   : > { %1405 = vmatmul.mubr.f32.gmra.mxu0 %v285_v61 }
  0xc2   : > { %1406 = vmatprep.mubr.f32.mxu0 %v286_v62 }
  0xc5   : > { %1407 = vmatmul.mubr.f32.gmra.mxu0 %v286_v62 }
  0xc6   : > { %1408 = vmatprep.mubr.f32.mxu0 %v287_v63 }
  0xc9   : > { %1409 = vmatmul.mubr.f32.gmra.mxu0 %v287_v63 }
  0xca   : > { %1410 = vmatprep.mubr.f32.mxu0 %v288_v0 }
  0xcd   : > { %1411 = vmatmul.mubr.f32.gmra.mxu0 %v288_v0 }
  0xce   : > { %1412 = vmatprep.mubr.f32.mxu0 %v289_v1 }
  0xd1   : > { %1413 = vmatmul.mubr.f32.gmra.mxu0 %v289_v1 }
  0xd2   : > { %1414 = vmatprep.mubr.f32.mxu0 %v290_v2 }
  0xd5   : > { %1415 = vmatmul.mubr.f32.gmra.mxu0 %v290_v2 }
  0xd6   : > { %1416 = vmatprep.mubr.f32.mxu0 %v291_v3 }
  0xd9   : > { %1417 = vmatmul.mubr.f32.gmra.mxu0 %v291_v3 }
  0xda   : > { %1418 = vmatprep.mubr.f32.mxu0 %v292_v6 }
  0xdd   : > { %1419 = vmatmul.mubr.f32.gmra.mxu0 %v292_v6 }
  0xde   : > { %1420 = vmatprep.mubr.f32.mxu0 %v293_v9 }
  0xe1   : > { %1421 = vmatmul.mubr.f32.gmra.mxu0 %v293_v9 }
  0xe2   : > { %1422 = vmatprep.mubr.f32.mxu0 %v294_v12 }
  0xe5   : > { %1423 = vmatmul.mubr.f32.gmra.mxu0 %v294_v12 }
  0xe6   : > { %1424 = vmatprep.mubr.f32.mxu0 %v295_v15 }
  0xe9   : > { %1425 = vmatmul.mubr.f32.gmra.mxu0 %v295_v15 }
  0xea   : > { %1426 = vmatprep.mubr.f32.mxu0 %v296_v18 }
  0xed   : > { %1427 = vmatmul.mubr.f32.gmra.mxu0 %v296_v18 }
  0xee   : > { %1428 = vmatprep.mubr.f32.mxu0 %v297_v21 }
  0xf1   : > { %1429 = vmatmul.mubr.f32.gmra.mxu0 %v297_v21 }
  0xf2   : > { %1430 = vmatprep.mubr.f32.mxu0 %v298_v24 }
  0xf5   : > { %1431 = vmatmul.mubr.f32.gmra.mxu0 %v298_v24 }
  0xf6   : > { %1432 = vmatprep.mubr.f32.mxu0 %v299_v25 }
  0xf9   : > { %1433 = vmatmul.mubr.f32.gmra.mxu0 %v299_v25 }
  0xfa   : > { %1434 = vmatprep.mubr.f32.mxu0 %v300_v26 }
  0xfd   : > { %1435 = vmatmul.mubr.f32.gmra.mxu0 %v300_v26 }
  0xfe   : > { %1436 = vmatprep.mubr.f32.mxu0 %v301_v27 }
 0x101   : > { %1437 = vmatmul.mubr.f32.gmra.mxu0 %v301_v27 }
 0x102   : > { %1438 = vmatprep.mubr.f32.mxu0 %v302_v28 }
 0x105   : > { %1439 = vmatmul.mubr.f32.gmra.mxu0 %v302_v28 }
 0x106   : > { %1440 = vmatprep.mubr.f32.mxu0 %v303_v29 }
 0x109   : > { %1441 = vmatmul.mubr.f32.gmra.mxu0 %v303_v29 }
 0x10a   : > { %1442 = vmatprep.mubr.f32.mxu0 %v304_v30 }
 0x10d   : > { %1443 = vmatmul.mubr.f32.gmra.mxu0 %v304_v30 }
 0x10e   : > { %1444 = vmatprep.mubr.f32.mxu0 %v305_v31 }
 0x111   : > { %1445 = vmatmul.mubr.f32.gmra.mxu0 %v305_v31 }
 0x155   : > { %v416_v39 = vpop.f32.mrf.mxu0 }
 0x156   : > { %v417_v40 = vadd.f32 %v416_v39, %v2021_v37 }
 0x157   : > { %v418_v41 = vpop.f32.mrf.mxu0 }
 0x158   : > { %v607_v42 = vmul.f32 0.70710677, %v417_v40  ;;  %v419_v43 = vadd.f32 %v418_v41, %v2023_v38 }
 0x159   : > { %v422_v44 = vpop.f32.mrf.mxu0 }
 0x15a   : > { %1519 = verf.f32 %v607_v42  ;;  %v608_v45 = vmul.f32 0.70710677, %v419_v43  ;;  %v2028_v46 = vadd.f32 %v422_v44, %v2021_v37 }
 0x15b   : > { %v424_v47 = vpop.f32.mrf.mxu0 }
 0x15c   : > { %1521 = verf.f32 %v608_v45  ;;  %v609_v48 = vmul.f32 0.70710677, %v2028_v46  ;;  %v425_v49 = vadd.f32 %v424_v47, %v2023_v38 }
 0x15d   : > { %v428_v50 = vpop.f32.mrf.mxu0 }
 0x15e   : > { %1523 = verf.f32 %v609_v48  ;;  %v610_v51 = vmul.f32 0.70710677, %v425_v49  ;;  %v2033_v52 = vadd.f32 %v428_v50, %v2021_v37 }
 0x15f   : > { %v430_v53 = vpop.f32.mrf.mxu0 }
 0x160   : > { %1525 = verf.f32 %v610_v51  ;;  %v611_v54 = vmul.f32 0.70710677, %v2033_v52  ;;  %v2037_v55 = vadd.f32 %v430_v53, %v2023_v38 }
 0x161   : > { %v434_v56 = vpop.f32.mrf.mxu0 }
 0x162   : > { %1527 = verf.f32 %v611_v54  ;;  %v612_v57 = vmul.f32 0.70710677, %v2037_v55  ;;  %v2041_v58 = vadd.f32 %v434_v56, %v2021_v37 }
 0x163   : > { %v436_v59 = vpop.f32.mrf.mxu0 }
 0x164   : > { %1529 = verf.f32 %v612_v57  ;;  %v613_v60 = vmul.f32 0.70710677, %v2041_v58  ;;  %v2045_v61 = vadd.f32 %v436_v59, %v2023_v38 }
 0x165   : > { %v440_v62 = vpop.f32.mrf.mxu0 }
 0x166   : > { %1531 = verf.f32 %v613_v60  ;;  %v614_v63 = vmul.f32 0.70710677, %v2045_v61  ;;  %v2049_v0 = vadd.f32 %v440_v62, %v2021_v37 }
 0x167   : > { %v1520_v1 = vpop.eup %1519  ;;  %v442_v2 = vpop.f32.mrf.mxu0 }
 0x168   : > { %v735_v3 = vmul.f32 0.5, %v1520_v1  ;;  %1533 = verf.f32 %v614_v63  ;;  %v615_v4 = vmul.f32 0.70710677, %v2049_v0  ;;  %v2053_v5 = vadd.f32 %v442_v2, %v2023_v38 }
 0x169   : > { %v1522_v6 = vpop.eup %1521  ;;  %v446_v7 = vpop.f32.mrf.mxu0 }
 0x16a   : > { %1535 = verf.f32 %v615_v4  ;;  %v616_v8 = vmul.f32 0.70710677, %v2053_v5  ;;  %v2057_v9 = vadd.f32 %v446_v7, %v2021_v37  ;;  %v799_v11 = vadd.f32 0.5, %v735_v3 }
 0x16b   : > { %v1524_v10 = vpop.eup %1523  ;;  %v448_v12 = vpop.f32.mrf.mxu0  ;;  %v736_v13 = vmul.f32 0.5, %v1522_v6 }
 0x16c   : > { %v737_v14 = vmul.f32 0.5, %v1524_v10  ;;  %1537 = verf.f32 %v616_v8  ;;  %v617_v15 = vmul.f32 0.70710677, %v2057_v9  ;;  %v2061_v17 = vadd.f32 %v448_v12, %v2023_v38 }
 0x16d   : > { %v1526_v16 = vpop.eup %1525  ;;  %v452_v18 = vpop.f32.mrf.mxu0  ;;  %v800_v19 = vadd.f32 0.5, %v736_v13  ;;  %v863_v23 = vmul.f32 %v799_v11, %v417_v40 }
 0x16e   : > { %v738_v20 = vmul.f32 0.5, %v1526_v16  ;;  %1539 = verf.f32 %v617_v15  ;;  %v2064_v21 = vadd.f32 %v452_v18, %v2021_v37  ;;  %v618_v24 = vmul.f32 0.70710677, %v2061_v17 }
 0x16f   : > { %v1528_v22 = vpop.eup %1527  ;;  %v454_v25 = vpop.f32.mrf.mxu0  ;;  %v864_v26 = vmul.f32 %v800_v19, %v419_v43  ;;  %v801_v27 = vadd.f32 0.5, %v737_v14 }
 0x170   : > { %v802_v28 = vadd.f32 0.5, %v738_v20  ;;  %v739_v29 = vmul.f32 0.5, %v1528_v22  ;;  %v619_v30 = vmul.f32 0.70710677, %v2064_v21  ;;  %1541 = verf.f32 %v618_v24 }
 0x171   : > { %v1530_v31 = vpop.eup %1529  ;;  %v2069_v32 = vadd.f32 %v454_v25, %v2023_v38  ;;  %1030 = vmatprep.mubr.f32.mxu1 %v864_v26  ;;  %v458_v33 = vpop.f32.mrf.mxu0  ;;  %v865_v43 = vmul.f32 %v801_v27, %v2028_v46 }
 0x172   : > { %v866_v34 = vmul.f32 %v802_v28, %v425_v49  ;;  %v740_v35 = vmul.f32 0.5, %v1530_v31  ;;  %1543 = verf.f32 %v619_v30  ;;  %1031 = vmatmul.mubr.f32.vlgmr.msra.gmra.mxu1 %v863_v23  ;;  %v803_v39 = vadd.f32 0.5, %v739_v29 }
 0x173   : > { %v1532_v36 = vpop.eup %1531  ;;  %v620_v40 = vmul.f32 0.70710677, %v2069_v32  ;;  %v2073_v41 = vadd.f32 %v458_v33, %v2021_v37  ;;  %v460_v42 = vpop.f32.mrf.mxu0 }
 0x174   : > { %v804_v44 = vadd.f32 0.5, %v740_v35  ;;  %v741_v45 = vmul.f32 0.5, %v1532_v36  ;;  %v2077_v47 = vadd.f32 %v460_v42, %v2023_v38  ;;  %1035 = vmatprep.mubr.f32.mxu1 %v866_v34  ;;  %v867_v46 = vmul.f32 %v803_v39, %v2033_v52 }
 0x175   : > { %v1534_v48 = vpop.eup %1533  ;;  %1545 = verf.f32 %v620_v40  ;;  %v621_v49 = vmul.f32 0.70710677, %v2073_v41  ;;  %v464_v50 = vpop.f32.mrf.mxu0 }
 0x176   : > { %v868_v51 = vmul.f32 %v804_v44, %v2037_v55  ;;  %v742_v53 = vmul.f32 0.5, %v1534_v48  ;;  %v622_v54 = vmul.f32 0.70710677, %v2077_v47  ;;  %1036 = vmatmul.mubr.f32.gmra.mxu1 %v865_v43  ;;  %v2084_v57 = vadd.f32 %v464_v50, %v2021_v37 }
 0x177   : > { %v1536_v56 = vpop.eup %1535  ;;  %1547 = verf.f32 %v621_v49  ;;  %v466_v59 = vpop.f32.mrf.mxu0  ;;  %v805_v60 = vadd.f32 0.5, %v741_v45 }
 0x178   : > { %v806_v62 = vadd.f32 0.5, %v742_v53  ;;  %v743_v63 = vmul.f32 0.5, %v1536_v56  ;;  %1549 = verf.f32 %v622_v54  ;;  %1040 = vmatprep.mubr.f32.mxu1 %v868_v51  ;;  %v623_v55 = vmul.f32 0.70710677, %v2084_v57 }
 0x179   : > { %v1538_v1 = vpop.eup %1537  ;;  %v2088_v2 = vadd.f32 %v466_v59, %v2023_v38  ;;  %v470_v3 = vpop.f32.mrf.mxu0  ;;  %v869_v12 = vmul.f32 %v805_v60, %v2041_v58 }
 0x17a   : > { %v870_v4 = vmul.f32 %v806_v62, %v2045_v61  ;;  %v744_v52 = vmul.f32 0.5, %v1538_v1  ;;  %v2092_v6 = vadd.f32 %v470_v3, %v2021_v37  ;;  %1041 = vmatmul.mubr.f32.gmra.mxu1 %v867_v46  ;;  %v807_v8 = vadd.f32 0.5, %v743_v63 }
 0x17b   : > { %v1540_v7 = vpop.eup %1539  ;;  %1551 = verf.f32 %v623_v55  ;;  %v624_v10 = vmul.f32 0.70710677, %v2088_v2  ;;  %v472_v11 = vpop.f32.mrf.mxu0 }
 0x17c   : > { %v808_v13 = vadd.f32 0.5, %v744_v52  ;;  %v745_v14 = vmul.f32 0.5, %v1540_v7  ;;  %v625_v15 = vmul.f32 0.70710677, %v2092_v6  ;;  %1045 = vmatprep.mubr.f32.mxu1 %v870_v4  ;;  %v2098_v61 = vadd.f32 %v472_v11, %v2023_v38 }
 0x17d   : > { %1553 = verf.f32 %v624_v10  ;;  %v476_v16 = vpop.f32.mrf.mxu0  ;;  %v1542_v18 = vpop.eup %1541  ;;  %v871_v58 = vmul.f32 %v807_v8, %v2049_v0 }
 0x17e   : > { %v872_v19 = vmul.f32 %v808_v13, %v2053_v5  ;;  %1555 = verf.f32 %v625_v15  ;;  %v2102_v20 = vadd.f32 %v476_v16, %v2021_v37  ;;  %1046 = vmatmul.mubr.f32.gmra.mxu1 %v869_v12  ;;  %v746_v23 = vmul.f32 0.5, %v1542_v18 }
 0x17f   : > { %v1544_v22 = vpop.eup %1543  ;;  %v626_v24 = vmul.f32 0.70710677, %v2098_v61  ;;  %v478_v25 = vpop.f32.mrf.mxu0  ;;  %v809_v26 = vadd.f32 0.5, %v745_v14 }
 0x180   : > { %v747_v27 = vmul.f32 0.5, %v1544_v22  ;;  %v627_v28 = vmul.f32 0.70710677, %v2102_v20  ;;  %v2108_v29 = vadd.f32 %v478_v25, %v2023_v38  ;;  %1050 = vmatprep.mubr.f32.mxu1 %v872_v19  ;;  %v810_v5 = vadd.f32 0.5, %v746_v23 }
 0x181   : > { %1557 = verf.f32 %v626_v24  ;;  %v482_v30 = vpop.f32.mrf.mxu0  ;;  %v873_v42 = vmul.f32 %v809_v26, %v2057_v9 }
 0x182   : > { %v1546_v31 = vpop.eup %1545  ;;  %1559 = verf.f32 %v627_v28  ;;  %v628_v33 = vmul.f32 0.70710677, %v2108_v29  ;;  %v2112_v0 = vadd.f32 %v482_v30, %v2021_v37  ;;  %1051 = vmatmul.mubr.f32.gmra.mxu1 %v871_v58  ;;  %v874_v34 = vmul.f32 %v810_v5, %v2061_v17 }
 0x183   : > { %v811_v35 = vadd.f32 0.5, %v747_v27  ;;  %v748_v36 = vmul.f32 0.5, %v1546_v31  ;;  %v484_v39 = vpop.f32.mrf.mxu0 }
 0x184   : > { %v1548_v40 = vpop.eup %1547  ;;  %1561 = verf.f32 %v628_v33  ;;  %v629_v43 = vmul.f32 0.70710677, %v2112_v0  ;;  %v2118_v44 = vadd.f32 %v484_v39, %v2023_v38  ;;  %1055 = vmatprep.mubr.f32.mxu1 %v874_v34 }
 0x185   : > { %v1550_v45 = vpop.eup %1549  ;;  %v812_v48 = vadd.f32 0.5, %v748_v36  ;;  %v749_v49 = vmul.f32 0.5, %v1548_v40  ;;  %v488_v50 = vpop.f32.mrf.mxu0  ;;  %v875_v9 = vmul.f32 %v811_v35, %v2064_v21 }
 0x186   : > { %v750_v51 = vmul.f32 0.5, %v1550_v45  ;;  %1563 = verf.f32 %v629_v43  ;;  %v630_v17 = vmul.f32 0.70710677, %v2118_v44  ;;  %v2122_v53 = vadd.f32 %v488_v50, %v2021_v37  ;;  %1056 = vmatmul.mubr.f32.gmra.mxu1 %v873_v42 }
 0x187   : > { %v876_v54 = vmul.f32 %v812_v48, %v2069_v32  ;;  %v813_v56 = vadd.f32 0.5, %v749_v49  ;;  %v490_v46 = vpop.f32.mrf.mxu0 }
 0x188   : > { %v1552_v59 = vpop.eup %1551  ;;  %v814_v60 = vadd.f32 0.5, %v750_v51  ;;  %1565 = verf.f32 %v630_v17  ;;  %v631_v62 = vmul.f32 0.70710677, %v2122_v53  ;;  %v2128_v63 = vadd.f32 %v490_v46, %v2023_v38 }
 0x189   : > { %v751_v1 = vmul.f32 0.5, %v1552_v59  ;;  %1060 = vmatprep.mubr.f32.mxu1 %v876_v54  ;;  %v494_v55 = vpop.f32.mrf.mxu0  ;;  %v877_v7 = vmul.f32 %v813_v56, %v2073_v41 }
 0x18a   : > { %v1554_v3 = vpop.eup %1553  ;;  %v878_v4 = vmul.f32 %v814_v60, %v2077_v47  ;;  %1567 = verf.f32 %v631_v62  ;;  %v632_v21 = vmul.f32 0.70710677, %v2128_v63  ;;  %v2133_v32 = vadd.f32 %v494_v55, %v2021_v37  ;;  %1061 = vmatmul.mubr.f32.gmra.mxu1 %v875_v9 }
 0x18b   : > { %v1556_v52 = vpop.eup %1555  ;;  %v815_v8 = vadd.f32 0.5, %v751_v1  ;;  %v752_v10 = vmul.f32 0.5, %v1554_v3  ;;  %v496_v11 = vpop.f32.mrf.mxu0 }
 0x18c   : > { %v753_v12 = vmul.f32 0.5, %v1556_v52  ;;  %1569 = verf.f32 %v632_v21  ;;  %v633_v13 = vmul.f32 0.70710677, %v2133_v32  ;;  %v2138_v14 = vadd.f32 %v496_v11, %v2023_v38  ;;  %1065 = vmatprep.mubr.f32.mxu1 %v878_v4 }
 0x18d   : > { %v816_v47 = vadd.f32 0.5, %v752_v10  ;;  %v500_v15 = vpop.f32.mrf.mxu0  ;;  %v879_v25 = vmul.f32 %v815_v8, %v2084_v57 }
 0x18e   : > { %v1558_v16 = vpop.eup %1557  ;;  %1571 = verf.f32 %v633_v13  ;;  %v634_v18 = vmul.f32 0.70710677, %v2138_v14  ;;  %v2142_v19 = vadd.f32 %v500_v15, %v2021_v37  ;;  %1066 = vmatmul.mubr.f32.gmra.mxu1 %v877_v7  ;;  %v817_v58 = vadd.f32 0.5, %v753_v12 }
 0x18f   : > { %v1560_v41 = vpop.eup %1559  ;;  %v880_v22 = vmul.f32 %v816_v47, %v2088_v2  ;;  %v754_v23 = vmul.f32 0.5, %v1558_v16  ;;  %v502_v24 = vpop.f32.mrf.mxu0 }
 0x190   : > { %v755_v26 = vmul.f32 0.5, %v1560_v41  ;;  %1573 = verf.f32 %v634_v18  ;;  %v635_v27 = vmul.f32 0.70710677, %v2142_v19  ;;  %v2148_v30 = vadd.f32 %v502_v24, %v2023_v38 }
 0x191   : > { %v1562_v28 = vpop.eup %1561  ;;  %v818_v5 = vadd.f32 0.5, %v754_v23  ;;  %1070 = vmatprep.mubr.f32.mxu1 %v880_v22  ;;  %v506_v31 = vpop.f32.mrf.mxu0  ;;  %v881_v57 = vmul.f32 %v817_v58, %v2092_v6 }
 0x192   : > { %v756_v33 = vmul.f32 0.5, %v1562_v28  ;;  %1575 = verf.f32 %v635_v27  ;;  %v2151_v2 = vadd.f32 %v506_v31, %v2021_v37  ;;  %1071 = vmatmul.mubr.f32.gmra.mxu1 %v879_v25  ;;  %v636_v36 = vmul.f32 0.70710677, %v2148_v30 }
 0x193   : > { %v1564_v34 = vpop.eup %1563  ;;  %v882_v35 = vmul.f32 %v818_v5, %v2098_v61  ;;  %v508_v39 = vpop.f32.mrf.mxu0  ;;  %v819_v40 = vadd.f32 0.5, %v755_v26 }
 0x194   : > { %v820_v42 = vadd.f32 0.5, %v756_v33  ;;  %v757_v43 = vmul.f32 0.5, %v1564_v34  ;;  %v637_v45 = vmul.f32 0.70710677, %v2151_v2  ;;  %1577 = verf.f32 %v636_v36 }
 0x195   : > { %v1566_v48 = vpop.eup %1565  ;;  %v2158_v49 = vadd.f32 %v508_v39, %v2023_v38  ;;  %1075 = vmatprep.mubr.f32.mxu1 %v882_v35  ;;  %v512_v50 = vpop.f32.mrf.mxu0  ;;  %v883_v46 = vmul.f32 %v819_v40, %v2102_v20 }
 0x196   : > { %v884_v51 = vmul.f32 %v820_v42, %v2108_v29  ;;  %v758_v6 = vmul.f32 0.5, %v1566_v48  ;;  %1579 = verf.f32 %v637_v45  ;;  %1076 = vmatmul.mubr.f32.gmra.mxu1 %v881_v57  ;;  %v821_v17 = vadd.f32 0.5, %v757_v43 }
 0x197   : > { %v1568_v61 = vpop.eup %1567  ;;  %v638_v9 = vmul.f32 0.70710677, %v2158_v49  ;;  %v2163_v54 = vadd.f32 %v512_v50, %v2021_v37  ;;  %v514_v56 = vpop.f32.mrf.mxu0 }
 0x198   : > { %v822_v59 = vadd.f32 0.5, %v758_v6  ;;  %v759_v60 = vmul.f32 0.5, %v1568_v61  ;;  %v2167_v62 = vadd.f32 %v514_v56, %v2023_v38  ;;  %1080 = vmatprep.mubr.f32.mxu1 %v884_v51  ;;  %v885_v20 = vmul.f32 %v821_v17, %v2112_v0 }
 0x199   : > { %v1570_v29 = vpop.eup %1569  ;;  %1581 = verf.f32 %v638_v9  ;;  %v639_v1 = vmul.f32 0.70710677, %v2163_v54  ;;  %v518_v55 = vpop.f32.mrf.mxu0 }
 0x19a   : > { %v886_v3 = vmul.f32 %v822_v59, %v2118_v44  ;;  %v760_v4 = vmul.f32 0.5, %v1570_v29  ;;  %v640_v21 = vmul.f32 0.70710677, %v2167_v62  ;;  %1081 = vmatmul.mubr.f32.gmra.mxu1 %v883_v46  ;;  %v2174_v7 = vadd.f32 %v518_v55, %v2021_v37 }
 0x19b   : > { %v1572_v52 = vpop.eup %1571  ;;  %1583 = verf.f32 %v639_v1  ;;  %v520_v8 = vpop.f32.mrf.mxu0  ;;  %v823_v10 = vadd.f32 0.5, %v759_v60 }
 0x19c   : > { %v824_v11 = vadd.f32 0.5, %v760_v4  ;;  %v761_v12 = vmul.f32 0.5, %v1572_v52  ;;  %1585 = verf.f32 %v640_v21  ;;  %1085 = vmatprep.mubr.f32.mxu1 %v886_v3  ;;  %v641_v44 = vmul.f32 0.70710677, %v2174_v7 }
 0x19d   : > { %v1574_v13 = vpop.eup %1573  ;;  %v2178_v47 = vadd.f32 %v520_v8, %v2023_v38  ;;  %v524_v15 = vpop.f32.mrf.mxu0  ;;  %v887_v24 = vmul.f32 %v823_v10, %v2122_v53 }
 0x19e   : > { %v888_v16 = vmul.f32 %v824_v11, %v2128_v63  ;;  %v762_v0 = vmul.f32 0.5, %v1574_v13  ;;  %v2182_v18 = vadd.f32 %v524_v15, %v2021_v37  ;;  %1086 = vmatmul.mubr.f32.gmra.mxu1 %v885_v20  ;;  %v825_v22 = vadd.f32 0.5, %v761_v12 }
 0x19f   : > { %v1576_v41 = vpop.eup %1575  ;;  %1587 = verf.f32 %v641_v44  ;;  %v642_v58 = vmul.f32 0.70710677, %v2178_v47  ;;  %v526_v23 = vpop.f32.mrf.mxu0 }
 0x1a0   : > { %v826_v25 = vadd.f32 0.5, %v762_v0  ;;  %v763_v26 = vmul.f32 0.5, %v1576_v41  ;;  %v643_v27 = vmul.f32 0.70710677, %v2182_v18  ;;  %1090 = vmatprep.mubr.f32.mxu1 %v888_v16  ;;  %v2188_v63 = vadd.f32 %v526_v23, %v2023_v38 }
 0x1a1   : > { %1589 = verf.f32 %v642_v58  ;;  %v530_v28 = vpop.f32.mrf.mxu0  ;;  %v1578_v5 = vpop.eup %1577  ;;  %v889_v53 = vmul.f32 %v825_v22, %v2133_v32 }
 0x1a2   : > { %v890_v31 = vmul.f32 %v826_v25, %v2138_v14  ;;  %1591 = verf.f32 %v643_v27  ;;  %v2192_v33 = vadd.f32 %v530_v28, %v2021_v37  ;;  %1091 = vmatmul.mubr.f32.gmra.mxu1 %v887_v24  ;;  %v764_v57 = vmul.f32 0.5, %v1578_v5 }
 0x1a3   : > { %v1580_v34 = vpop.eup %1579  ;;  %v644_v35 = vmul.f32 0.70710677, %v2188_v63  ;;  %v532_v36 = vpop.f32.mrf.mxu0  ;;  %v827_v39 = vadd.f32 0.5, %v763_v26 }
 0x1a4   : > { %v765_v40 = vmul.f32 0.5, %v1580_v34  ;;  %v645_v42 = vmul.f32 0.70710677, %v2192_v33  ;;  %v2198_v43 = vadd.f32 %v532_v36, %v2023_v38  ;;  %1095 = vmatprep.mubr.f32.mxu1 %v890_v31  ;;  %v828_v14 = vadd.f32 0.5, %v764_v57 }
 0x1a5   : > { %1593 = verf.f32 %v644_v35  ;;  %v536_v45 = vpop.f32.mrf.mxu0  ;;  %v891_v56 = vmul.f32 %v827_v39, %v2142_v19 }
 0x1a6   : > { %v1582_v48 = vpop.eup %1581  ;;  %1595 = verf.f32 %v645_v42  ;;  %v646_v50 = vmul.f32 0.70710677, %v2198_v43  ;;  %v2202_v32 = vadd.f32 %v536_v45, %v2021_v37  ;;  %1096 = vmatmul.mubr.f32.gmra.mxu1 %v889_v53  ;;  %v892_v51 = vmul.f32 %v828_v14, %v2148_v30 }
 0x1a7   : > { %v829_v6 = vadd.f32 0.5, %v765_v40  ;;  %v766_v61 = vmul.f32 0.5, %v1582_v48  ;;  %v538_v17 = vpop.f32.mrf.mxu0 }
 0x1a8   : > { %v1584_v9 = vpop.eup %1583  ;;  %1597 = verf.f32 %v646_v50  ;;  %v647_v46 = vmul.f32 0.70710677, %v2202_v32  ;;  %v2208_v59 = vadd.f32 %v538_v17, %v2023_v38  ;;  %1100 = vmatprep.mubr.f32.mxu1 %v892_v51 }
 0x1a9   : > { %v1586_v60 = vpop.eup %1585  ;;  %v830_v29 = vadd.f32 0.5, %v766_v61  ;;  %v767_v1 = vmul.f32 0.5, %v1584_v9  ;;  %v542_v55 = vpop.f32.mrf.mxu0  ;;  %v893_v19 = vmul.f32 %v829_v6, %v2151_v2 }
 0x1aa   : > { %v768_v3 = vmul.f32 0.5, %v1586_v60  ;;  %1599 = verf.f32 %v647_v46  ;;  %v648_v30 = vmul.f32 0.70710677, %v2208_v59  ;;  %v2212_v4 = vadd.f32 %v542_v55, %v2021_v37  ;;  %1101 = vmatmul.mubr.f32.gmra.mxu1 %v891_v56 }
 0x1ab   : > { %v894_v21 = vmul.f32 %v830_v29, %v2158_v49  ;;  %v831_v52 = vadd.f32 0.5, %v767_v1  ;;  %v544_v20 = vpop.f32.mrf.mxu0 }
 0x1ac   : > { %v1588_v8 = vpop.eup %1587  ;;  %v832_v10 = vadd.f32 0.5, %v768_v3  ;;  %1601 = verf.f32 %v648_v30  ;;  %v649_v11 = vmul.f32 0.70710677, %v2212_v4  ;;  %v2218_v12 = vadd.f32 %v544_v20, %v2023_v38 }
 0x1ad   : > { %v769_v13 = vmul.f32 0.5, %v1588_v8  ;;  %1105 = vmatprep.mubr.f32.mxu1 %v894_v21  ;;  %v548_v44 = vpop.f32.mrf.mxu0  ;;  %v895_v41 = vmul.f32 %v831_v52, %v2163_v54 }
 0x1ae   : > { %v1590_v15 = vpop.eup %1589  ;;  %v896_v16 = vmul.f32 %v832_v10, %v2167_v62  ;;  %1603 = verf.f32 %v649_v11  ;;  %v650_v2 = vmul.f32 0.70710677, %v2218_v12  ;;  %v2223_v49 = vadd.f32 %v548_v44, %v2021_v37  ;;  %1106 = vmatmul.mubr.f32.gmra.mxu1 %v893_v19 }
 0x1af   : > { %v1592_v0 = vpop.eup %1591  ;;  %v833_v22 = vadd.f32 0.5, %v769_v13  ;;  %v770_v58 = vmul.f32 0.5, %v1590_v15  ;;  %v550_v23 = vpop.f32.mrf.mxu0 }
 0x1b0   : > { %v771_v24 = vmul.f32 0.5, %v1592_v0  ;;  %1605 = verf.f32 %v650_v2  ;;  %v651_v25 = vmul.f32 0.70710677, %v2223_v49  ;;  %v2228_v26 = vadd.f32 %v550_v23, %v2023_v38  ;;  %1110 = vmatprep.mubr.f32.mxu1 %v896_v16 }
 0x1b1   : > { %v834_v62 = vadd.f32 0.5, %v770_v58  ;;  %v554_v27 = vpop.f32.mrf.mxu0  ;;  %v897_v36 = vmul.f32 %v833_v22, %v2174_v7 }
 0x1b2   : > { %v1594_v28 = vpop.eup %1593  ;;  %1607 = verf.f32 %v651_v25  ;;  %v652_v5 = vmul.f32 0.70710677, %v2228_v26  ;;  %v2232_v31 = vadd.f32 %v554_v27, %v2021_v37  ;;  %1111 = vmatmul.mubr.f32.gmra.mxu1 %v895_v41  ;;  %v835_v53 = vadd.f32 0.5, %v771_v24 }
 0x1b3   : > { %v1596_v54 = vpop.eup %1595  ;;  %v898_v34 = vmul.f32 %v834_v62, %v2178_v47  ;;  %v772_v57 = vmul.f32 0.5, %v1594_v28  ;;  %v556_v35 = vpop.f32.mrf.mxu0 }
 0x1b4   : > { %v773_v39 = vmul.f32 0.5, %v1596_v54  ;;  %1609 = verf.f32 %v652_v5  ;;  %v653_v40 = vmul.f32 0.70710677, %v2232_v31  ;;  %v2238_v45 = vadd.f32 %v556_v35, %v2023_v38 }
 0x1b5   : > { %v1598_v42 = vpop.eup %1597  ;;  %v836_v14 = vadd.f32 0.5, %v772_v57  ;;  %1115 = vmatprep.mubr.f32.mxu1 %v898_v34  ;;  %v560_v48 = vpop.f32.mrf.mxu0  ;;  %v899_v7 = vmul.f32 %v835_v53, %v2182_v18 }
 0x1b6   : > { %v774_v50 = vmul.f32 0.5, %v1598_v42  ;;  %1611 = verf.f32 %v653_v40  ;;  %v2241_v47 = vadd.f32 %v560_v48, %v2021_v37  ;;  %1116 = vmatmul.mubr.f32.gmra.mxu1 %v897_v36  ;;  %v654_v61 = vmul.f32 0.70710677, %v2238_v45 }
 0x1b7   : > { %v1600_v51 = vpop.eup %1599  ;;  %v900_v6 = vmul.f32 %v836_v14, %v2188_v63  ;;  %v562_v17 = vpop.f32.mrf.mxu0  ;;  %v837_v9 = vadd.f32 0.5, %v773_v39 }
 0x1b8   : > { %v838_v56 = vadd.f32 0.5, %v774_v50  ;;  %v775_v46 = vmul.f32 0.5, %v1600_v51  ;;  %v655_v60 = vmul.f32 0.70710677, %v2241_v47  ;;  %1613 = verf.f32 %v654_v61 }
 0x1b9   : > { %v1602_v29 = vpop.eup %1601  ;;  %v2248_v1 = vadd.f32 %v562_v17, %v2023_v38  ;;  %1120 = vmatprep.mubr.f32.mxu1 %v900_v6  ;;  %v566_v55 = vpop.f32.mrf.mxu0  ;;  %v901_v20 = vmul.f32 %v837_v9, %v2192_v33 }
 0x1ba   : > { %v902_v3 = vmul.f32 %v838_v56, %v2198_v43  ;;  %v776_v18 = vmul.f32 0.5, %v1602_v29  ;;  %1615 = verf.f32 %v655_v60  ;;  %1121 = vmatmul.mubr.f32.gmra.mxu1 %v899_v7  ;;  %v839_v30 = vadd.f32 0.5, %v775_v46 }
 0x1bb   : > { %v1604_v63 = vpop.eup %1603  ;;  %v656_v19 = vmul.f32 0.70710677, %v2248_v1  ;;  %v2253_v21 = vadd.f32 %v566_v55, %v2021_v37  ;;  %v568_v52 = vpop.f32.mrf.mxu0 }
 0x1bc   : > { %v840_v8 = vadd.f32 0.5, %v776_v18  ;;  %v777_v10 = vmul.f32 0.5, %v1604_v63  ;;  %v2257_v11 = vadd.f32 %v568_v52, %v2023_v38  ;;  %1125 = vmatprep.mubr.f32.mxu1 %v902_v3  ;;  %v903_v33 = vmul.f32 %v839_v30, %v2202_v32 }
 0x1bd   : > { %v1606_v43 = vpop.eup %1605  ;;  %1617 = verf.f32 %v656_v19  ;;  %v657_v13 = vmul.f32 0.70710677, %v2253_v21  ;;  %v572_v44 = vpop.f32.mrf.mxu0 }
 0x1be   : > { %v904_v15 = vmul.f32 %v840_v8, %v2208_v59  ;;  %v778_v16 = vmul.f32 0.5, %v1606_v43  ;;  %v658_v2 = vmul.f32 0.70710677, %v2257_v11  ;;  %1126 = vmatmul.mubr.f32.gmra.mxu1 %v901_v20  ;;  %v2264_v41 = vadd.f32 %v572_v44, %v2021_v37 }
 0x1bf   : > { %v1608_v0 = vpop.eup %1607  ;;  %1619 = verf.f32 %v657_v13  ;;  %v574_v22 = vpop.f32.mrf.mxu0  ;;  %v841_v58 = vadd.f32 0.5, %v777_v10 }
 0x1c0   : > { %v842_v23 = vadd.f32 0.5, %v778_v16  ;;  %v779_v24 = vmul.f32 0.5, %v1608_v0  ;;  %1621 = verf.f32 %v658_v2  ;;  %1130 = vmatprep.mubr.f32.mxu1 %v904_v15  ;;  %v659_v59 = vmul.f32 0.70710677, %v2264_v41 }
 0x1c1   : > { %v1610_v25 = vpop.eup %1609  ;;  %v2268_v62 = vadd.f32 %v574_v22, %v2023_v38  ;;  %v578_v27 = vpop.f32.mrf.mxu0  ;;  %v905_v35 = vmul.f32 %v841_v58, %v2212_v4 }
 0x1c2   : > { %v906_v28 = vmul.f32 %v842_v23, %v2218_v12  ;;  %v780_v32 = vmul.f32 0.5, %v1610_v25  ;;  %v2272_v5 = vadd.f32 %v578_v27, %v2021_v37  ;;  %1131 = vmatmul.mubr.f32.gmra.mxu1 %v903_v33  ;;  %v843_v34 = vadd.f32 0.5, %v779_v24 }
 0x1c3   : > { %v1612_v54 = vpop.eup %1611  ;;  %1623 = verf.f32 %v659_v59  ;;  %v660_v53 = vmul.f32 0.70710677, %v2268_v62  ;;  %v580_v57 = vpop.f32.mrf.mxu0 }
 0x1c4   : > { %v844_v36 = vadd.f32 0.5, %v780_v32  ;;  %v781_v39 = vmul.f32 0.5, %v1612_v54  ;;  %v661_v40 = vmul.f32 0.70710677, %v2272_v5  ;;  %1135 = vmatprep.mubr.f32.mxu1 %v906_v28  ;;  %v2278_v12 = vadd.f32 %v580_v57, %v2023_v38 }
 0x1c5   : > { %1625 = verf.f32 %v660_v53  ;;  %v584_v42 = vpop.f32.mrf.mxu0  ;;  %v1614_v14 = vpop.eup %1613  ;;  %v907_v4 = vmul.f32 %v843_v34, %v2223_v49 }
 0x1c6   : > { %v908_v48 = vmul.f32 %v844_v36, %v2228_v26  ;;  %1627 = verf.f32 %v661_v40  ;;  %v2282_v50 = vadd.f32 %v584_v42, %v2021_v37  ;;  %1136 = vmatmul.mubr.f32.gmra.mxu1 %v905_v35  ;;  %v782_v7 = vmul.f32 0.5, %v1614_v14 }
 0x1c7   : > { %v1616_v51 = vpop.eup %1615  ;;  %v662_v6 = vmul.f32 0.70710677, %v2278_v12  ;;  %v586_v61 = vpop.f32.mrf.mxu0  ;;  %v845_v17 = vadd.f32 0.5, %v781_v39 }
 0x1c8   : > { %v783_v9 = vmul.f32 0.5, %v1616_v51  ;;  %v663_v56 = vmul.f32 0.70710677, %v2282_v50  ;;  %v2288_v46 = vadd.f32 %v586_v61, %v2023_v38  ;;  %1140 = vmatprep.mubr.f32.mxu1 %v908_v48  ;;  %v846_v26 = vadd.f32 0.5, %v782_v7 }
 0x1c9   : > { %1629 = verf.f32 %v662_v6  ;;  %v590_v60 = vpop.f32.mrf.mxu0  ;;  %v909_v52 = vmul.f32 %v845_v17, %v2232_v31 }
 0x1ca   : > { %v1618_v29 = vpop.eup %1617  ;;  %1631 = verf.f32 %v663_v56  ;;  %v664_v55 = vmul.f32 0.70710677, %v2288_v46  ;;  %v2292_v49 = vadd.f32 %v590_v60, %v2021_v37  ;;  %1141 = vmatmul.mubr.f32.gmra.mxu1 %v907_v4  ;;  %v910_v3 = vmul.f32 %v846_v26, %v2238_v45 }
 0x1cb   : > { %v847_v18 = vadd.f32 0.5, %v783_v9  ;;  %v784_v63 = vmul.f32 0.5, %v1618_v29  ;;  %v592_v30 = vpop.f32.mrf.mxu0 }
 0x1cc   : > { %v1620_v19 = vpop.eup %1619  ;;  %1633 = verf.f32 %v664_v55  ;;  %v665_v20 = vmul.f32 0.70710677, %v2292_v49  ;;  %v2298_v8 = vadd.f32 %v592_v30, %v2023_v38  ;;  %1145 = vmatprep.mubr.f32.mxu1 %v910_v3 }
 0x1cd   : > { %v1622_v10 = vpop.eup %1621  ;;  %v848_v43 = vadd.f32 0.5, %v784_v63  ;;  %v785_v13 = vmul.f32 0.5, %v1620_v19  ;;  %v596_v44 = vpop.f32.mrf.mxu0  ;;  %v911_v31 = vmul.f32 %v847_v18, %v2241_v47 }
 0x1ce   : > { %v786_v15 = vmul.f32 0.5, %v1622_v10  ;;  %1635 = verf.f32 %v665_v20  ;;  %v666_v45 = vmul.f32 0.70710677, %v2298_v8  ;;  %v2302_v16 = vadd.f32 %v596_v44, %v2021_v37  ;;  %1146 = vmatmul.mubr.f32.gmra.mxu1 %v909_v52 }
 0x1cf   : > { %v912_v2 = vmul.f32 %v848_v43, %v2248_v1  ;;  %v849_v0 = vadd.f32 0.5, %v785_v13  ;;  %v598_v33 = vpop.f32.mrf.mxu0 }
 0x1d0   : > { %v1624_v22 = vpop.eup %1623  ;;  %v850_v58 = vadd.f32 0.5, %v786_v15  ;;  %1637 = verf.f32 %v666_v45  ;;  %v667_v23 = vmul.f32 0.70710677, %v2302_v16  ;;  %v2308_v24 = vadd.f32 %v598_v33, %v2023_v38 }
 0x1d1   : > { %v787_v25 = vmul.f32 0.5, %v1624_v22  ;;  %1150 = vmatprep.mubr.f32.mxu1 %v912_v2  ;;  %v602_v59 = vpop.f32.mrf.mxu0  ;;  %v913_v54 = vmul.f32 %v849_v0, %v2253_v21 }
 0x1d2   : > { %v1626_v27 = vpop.eup %1625  ;;  %v914_v28 = vmul.f32 %v850_v58, %v2257_v11  ;;  %1639 = verf.f32 %v667_v23  ;;  %v668_v47 = vmul.f32 0.70710677, %v2308_v24  ;;  %v2313_v1 = vadd.f32 %v602_v59, %v2021_v37  ;;  %1151 = vmatmul.mubr.f32.gmra.mxu1 %v911_v31 }
 0x1d3   : > { %v1628_v32 = vpop.eup %1627  ;;  %v851_v34 = vadd.f32 0.5, %v787_v25  ;;  %v788_v53 = vmul.f32 0.5, %v1626_v27  ;;  %v604_v57 = vpop.f32.mrf.mxu0 }
 0x1d4   : > { %v789_v35 = vmul.f32 0.5, %v1628_v32  ;;  %1641 = verf.f32 %v668_v47  ;;  %v669_v36 = vmul.f32 0.70710677, %v2313_v1  ;;  %v605_v39 = vadd.f32 %v604_v57, %v2023_v38  ;;  %1155 = vmatprep.mubr.f32.mxu1 %v914_v28 }
 0x1d5   : > { %v852_v11 = vadd.f32 0.5, %v788_v53  ;;  %v915_v21 = vmul.f32 %v851_v34, %v2264_v41 }
 0x1d6   : > { %v1630_v40 = vpop.eup %1629  ;;  %1643 = verf.f32 %v669_v36  ;;  %v670_v42 = vmul.f32 0.70710677, %v605_v39  ;;  %1156 = vmatmul.mubr.f32.gmra.mxu1 %v913_v54  ;;  %v853_v51 = vadd.f32 0.5, %v789_v35 }
 0x1d7   : > { %v1632_v37 = vpop.eup %1631  ;;  %v916_v14 = vmul.f32 %v852_v11, %v2268_v62  ;;  %v790_v48 = vmul.f32 0.5, %v1630_v40 }
 0x1d8   : > { %v791_v4 = vmul.f32 0.5, %v1632_v37  ;;  %1645 = verf.f32 %v670_v42  ;;  %v917_v9 = vmul.f32 %v853_v51, %v2272_v5 }
 0x1d9   : > { %v1634_v7 = vpop.eup %1633  ;;  %v854_v6 = vadd.f32 0.5, %v790_v48  ;;  %1160 = vmatprep.mubr.f32.mxu1 %v916_v14 }
 0x1da   : > { %v792_v61 = vmul.f32 0.5, %v1634_v7  ;;  %1161 = vmatmul.mubr.f32.gmra.mxu1 %v915_v21  ;;  %v855_v56 = vadd.f32 0.5, %v791_v4 }
 0x1db   : > { %v1636_v38 = vpop.eup %1635  ;;  %v918_v17 = vmul.f32 %v854_v6, %v2278_v12 }
 0x1dc   : > { %v856_v26 = vadd.f32 0.5, %v792_v61  ;;  %v793_v60 = vmul.f32 0.5, %v1636_v38  ;;  %v919_v3 = vmul.f32 %v855_v56, %v2282_v50 }
 0x1dd   : > { %v1638_v62 = vpop.eup %1637  ;;  %1165 = vmatprep.mubr.f32.mxu1 %v918_v17 }
 0x1de   : > { %v920_v41 = vmul.f32 %v856_v26, %v2288_v46  ;;  %v794_v29 = vmul.f32 0.5, %v1638_v62  ;;  %1166 = vmatmul.mubr.f32.gmra.mxu1 %v917_v9  ;;  %v857_v18 = vadd.f32 0.5, %v793_v60 }
 0x1df   : > { %v1640_v55 = vpop.eup %1639 }
 0x1e0   : > { %v858_v63 = vadd.f32 0.5, %v794_v29  ;;  %v795_v30 = vmul.f32 0.5, %v1640_v55  ;;  %1170 = vmatprep.mubr.f32.mxu1 %v920_v41  ;;  %v921_v20 = vmul.f32 %v857_v18, %v2292_v49  ;;  %v2332_v49 = vld [vmem:[%s2456_s4] ss:$0 sm:$0xff] }
 0x1e1   : > { %v1642_v19 = vpop.eup %1641 }
 0x1e2   : > { %v922_v12 = vmul.f32 %v858_v63, %v2298_v8  ;;  %v796_v5 = vmul.f32 0.5, %v1642_v19  ;;  %1171 = vmatmul.mubr.f32.gmra.mxu1 %v919_v3  ;;  %v859_v10 = vadd.f32 0.5, %v795_v30 }
 0x1e3   : > { %v1644_v52 = vpop.eup %1643 }
 0x1e4   : > { %v860_v43 = vadd.f32 0.5, %v796_v5  ;;  %v797_v46 = vmul.f32 0.5, %v1644_v52  ;;  %1175 = vmatprep.mubr.f32.mxu1 %v922_v12  ;;  %v923_v15 = vmul.f32 %v859_v10, %v2302_v16 }
 0x1e5   : > { %v1646_v13 = vpop.eup %1645 }
 0x1e6   : > { %v924_v44 = vmul.f32 %v860_v43, %v2308_v24  ;;  %v798_v50 = vmul.f32 0.5, %v1646_v13  ;;  %1176 = vmatmul.mubr.f32.gmra.mxu1 %v921_v20  ;;  %v861_v45 = vadd.f32 0.5, %v797_v46 }
 0x1e8   : > { %v862_v31 = vadd.f32 0.5, %v798_v50  ;;  %1180 = vmatprep.mubr.f32.mxu1 %v924_v44  ;;  %v925_v2 = vmul.f32 %v861_v45, %v2313_v1 }
 0x1ea   : > { %v926_v8 = vmul.f32 %v862_v31, %v605_v39  ;;  %1181 = vmatmul.mubr.f32.gmra.mxu1 %v923_v15 }
 0x1ec   : > { %1185 = vmatprep.mubr.f32.mxu1 %v926_v8 }
 0x1ee   : > { %1186 = vmatmul.mubr.f32.gmra.mxu1 %v925_v2 }
 0x232   : > { %v1032_v0 = vpop.f32.mrf.mxu1 }
 0x233   : > { %v1033_v33 = vadd.f32 %v2332_v49, %v1032_v0 }
 0x234   : > { %v1034_v22 = vpop.f32.mrf.mxu1 }
 0x235   : > { %1191 = vst [vmem:[%s2337_s14] sm:$0xff] %v1033_v33 }
 0x236   : > { %v1037_v16 = vpop.f32.mrf.mxu1 }
 0x237   : > { %v1038_v58 = vadd.f32 %v2332_v49, %v1037_v16 }
 0x238   : > { %v1039_v23 = vpop.f32.mrf.mxu1 }
 0x239   : > { %1192 = vst [vmem:[%s2337_s14 + $0x8] sm:$0xff] %v1038_v58 }
 0x23a   : > { %v1042_v24 = vpop.f32.mrf.mxu1 }
 0x23b   : > { %v1043_v25 = vadd.f32 %v2332_v49, %v1042_v24 }
 0x23c   : > { %v1044_v59 = vpop.f32.mrf.mxu1 }
 0x23d   : > { %1193 = vst [vmem:[%s2337_s14 + $0x10] sm:$0xff] %v1043_v25 }
 0x23e   : > { %v1047_v27 = vpop.f32.mrf.mxu1 }
 0x23f   : > { %v1048_v28 = vadd.f32 %v2332_v49, %v1047_v27 }
 0x240   : > { %v1049_v47 = vpop.f32.mrf.mxu1 }
 0x241   : > { %1194 = vst [vmem:[%s2337_s14 + $0x18] sm:$0xff] %v1048_v28 }
 0x242   : > { %v1052_v1 = vpop.f32.mrf.mxu1 }
 0x243   : > { %v1053_v32 = vadd.f32 %v2332_v49, %v1052_v1 }
 0x244   : > { %v1054_v54 = vpop.f32.mrf.mxu1 }
 0x245   : > { %1195 = vst [vmem:[%s2337_s14 + $0x20] sm:$0xff] %v1053_v32 }
 0x246   : > { %v1057_v34 = vpop.f32.mrf.mxu1 }
 0x247   : > { %v1058_v53 = vadd.f32 %v2332_v49, %v1057_v34 }
 0x248   : > { %v1059_v57 = vpop.f32.mrf.mxu1 }
 0x249   : > { %1196 = vst [vmem:[%s2337_s14 + $0x28] sm:$0xff] %v1058_v53 }
 0x24a   : > { %v1062_v35 = vpop.f32.mrf.mxu1 }
 0x24b   : > { %v1063_v36 = vadd.f32 %v2332_v49, %v1062_v35 }
 0x24c   : > { %v1064_v39 = vpop.f32.mrf.mxu1 }
 0x24d   : > { %1197 = vst [vmem:[%s2337_s14 + $0x30] sm:$0xff] %v1063_v36 }
 0x24e   : > { %v1067_v11 = vpop.f32.mrf.mxu1 }
 0x24f   : > { %v1068_v40 = vadd.f32 %v2332_v49, %v1067_v11 }
 0x250   : > { %v1069_v42 = vpop.f32.mrf.mxu1 }
 0x251   : > { %1198 = vst [vmem:[%s2337_s14 + $0x38] sm:$0xff] %v1068_v40 }
 0x252   : > { %v1072_v37 = vpop.f32.mrf.mxu1 }
 0x253   : > { %v1073_v14 = vadd.f32 %v2332_v49, %v1072_v37 }
 0x254   : > { %v1074_v48 = vpop.f32.mrf.mxu1 }
 0x255   : > { %1199 = vst [vmem:[%s2337_s14 + $0x40] sm:$0xff] %v1073_v14 }
 0x256   : > { %v1077_v21 = vpop.f32.mrf.mxu1 }
 0x257   : > { %v1078_v51 = vadd.f32 %v2332_v49, %v1077_v21 }
 0x258   : > { %v1079_v4 = vpop.f32.mrf.mxu1 }
 0x259   : > { %1200 = vst [vmem:[%s2337_s14 + $0x48] sm:$0xff] %v1078_v51 }
 0x25a   : > { %v1082_v7 = vpop.f32.mrf.mxu1 }
 0x25b   : > { %v1083_v6 = vadd.f32 %v2332_v49, %v1082_v7 }
 0x25c   : > { %v1084_v61 = vpop.f32.mrf.mxu1 }
 0x25d   : > { %1201 = vst [vmem:[%s2337_s14 + $0x50] sm:$0xff] %v1083_v6 }
 0x25e   : > { %v1087_v38 = vpop.f32.mrf.mxu1 }
 0x25f   : > { %v1088_v17 = vadd.f32 %v2332_v49, %v1087_v38 }
 0x260   : > { %v1089_v9 = vpop.f32.mrf.mxu1 }
 0x261   : > { %1202 = vst [vmem:[%s2337_s14 + $0x58] sm:$0xff] %v1088_v17 }
 0x262   : > { %v1092_v56 = vpop.f32.mrf.mxu1 }
 0x263   : > { %v1093_v26 = vadd.f32 %v2332_v49, %v1092_v56 }
 0x264   : > { %v1094_v60 = vpop.f32.mrf.mxu1 }
 0x265   : > { %1203 = vst [vmem:[%s2337_s14 + $0x60] sm:$0xff] %v1093_v26 }
 0x266   : > { %v1097_v62 = vpop.f32.mrf.mxu1 }
 0x267   : > { %v1098_v41 = vadd.f32 %v2332_v49, %v1097_v62 }
 0x268   : > { %v1099_v29 = vpop.f32.mrf.mxu1 }
 0x269   : > { %1204 = vst [vmem:[%s2337_s14 + $0x68] sm:$0xff] %v1098_v41 }
 0x26a   : > { %v1102_v55 = vpop.f32.mrf.mxu1 }
 0x26b   : > { %v1103_v3 = vadd.f32 %v2332_v49, %v1102_v55 }
 0x26c   : > { %v1104_v18 = vpop.f32.mrf.mxu1 }
 0x26d   : > { %1205 = vst [vmem:[%s2337_s14 + $0x70] sm:$0xff] %v1103_v3 }
 0x26e   : > { %v1107_v63 = vpop.f32.mrf.mxu1 }
 0x26f   : > { %v1108_v30 = vadd.f32 %v2332_v49, %v1107_v63 }
 0x270   : > { %v1109_v19 = vpop.f32.mrf.mxu1 }
 0x271   : > { %1206 = vst [vmem:[%s2337_s14 + $0x78] sm:$0xff] %v1108_v30 }
 0x272   : > { %v1112_v12 = vpop.f32.mrf.mxu1 }
 0x273   : > { %v1113_v5 = vadd.f32 %v2332_v49, %v1112_v12 }
 0x274   : > { %v1114_v52 = vpop.f32.mrf.mxu1 }
 0x275   : > { %1207 = vst [vmem:[%s2337_s14 + $0x80] sm:$0xff] %v1113_v5 }
 0x276   : > { %v1117_v20 = vpop.f32.mrf.mxu1 }
 0x277   : > { %v1118_v10 = vadd.f32 %v2332_v49, %v1117_v20 }
 0x278   : > { %v1119_v43 = vpop.f32.mrf.mxu1 }
 0x279   : > { %1208 = vst [vmem:[%s2337_s14 + $0x88] sm:$0xff] %v1118_v10 }
 0x27a   : > { %v1122_v46 = vpop.f32.mrf.mxu1 }
 0x27b   : > { %v1123_v13 = vadd.f32 %v2332_v49, %v1122_v46 }
 0x27c   : > { %v1124_v44 = vpop.f32.mrf.mxu1 }
 0x27d   : > { %1209 = vst [vmem:[%s2337_s14 + $0x90] sm:$0xff] %v1123_v13 }
 0x27e   : > { %v1127_v50 = vpop.f32.mrf.mxu1 }
 0x27f   : > { %v1128_v15 = vadd.f32 %v2332_v49, %v1127_v50 }
 0x280   : > { %v1129_v45 = vpop.f32.mrf.mxu1 }
 0x281   : > { %1210 = vst [vmem:[%s2337_s14 + $0x98] sm:$0xff] %v1128_v15 }
 0x282   : > { %v1132_v31 = vpop.f32.mrf.mxu1 }
 0x283   : > { %v1133_v8 = vadd.f32 %v2332_v49, %v1132_v31 }
 0x284   : > { %v1134_v2 = vpop.f32.mrf.mxu1 }
 0x285   : > { %1211 = vst [vmem:[%s2337_s14 + $0xa0] sm:$0xff] %v1133_v8 }
 0x286   : > { %v1137_v0 = vpop.f32.mrf.mxu1 }
 0x287   : > { %v1138_v33 = vadd.f32 %v2332_v49, %v1137_v0 }
 0x288   : > { %v1139_v22 = vpop.f32.mrf.mxu1 }
 0x289   : > { %1212 = vst [vmem:[%s2337_s14 + $0xa8] sm:$0xff] %v1138_v33 }
 0x28a   : > { %v1142_v16 = vpop.f32.mrf.mxu1 }
 0x28b   : > { %v1143_v58 = vadd.f32 %v2332_v49, %v1142_v16 }
 0x28c   : > { %v1144_v23 = vpop.f32.mrf.mxu1 }
 0x28d   : > { %1213 = vst [vmem:[%s2337_s14 + $0xb0] sm:$0xff] %v1143_v58 }
 0x28e   : > { %v1147_v24 = vpop.f32.mrf.mxu1 }
 0x28f   : > { %v1148_v25 = vadd.f32 %v2332_v49, %v1147_v24 }
 0x290   : > { %v1149_v59 = vpop.f32.mrf.mxu1 }
 0x291   : > { %1214 = vst [vmem:[%s2337_s14 + $0xb8] sm:$0xff] %v1148_v25 }
 0x292   : > { %v1152_v27 = vpop.f32.mrf.mxu1 }
 0x293   : > { %v1153_v28 = vadd.f32 %v2332_v49, %v1152_v27 }
 0x294   : > { %v1154_v47 = vpop.f32.mrf.mxu1 }
 0x295   : > { %1215 = vst [vmem:[%s2337_s14 + $0xc0] sm:$0xff] %v1153_v28 }
 0x296   : > { %v1157_v1 = vpop.f32.mrf.mxu1 }
 0x297   : > { %v1158_v32 = vadd.f32 %v2332_v49, %v1157_v1 }
 0x298   : > { %v1159_v54 = vpop.f32.mrf.mxu1 }
 0x299   : > { %1216 = vst [vmem:[%s2337_s14 + $0xc8] sm:$0xff] %v1158_v32 }
 0x29a   : > { %v1162_v34 = vpop.f32.mrf.mxu1 }
 0x29b   : > { %v1163_v53 = vadd.f32 %v2332_v49, %v1162_v34 }
 0x29c   : > { %v1164_v57 = vpop.f32.mrf.mxu1 }
 0x29d   : > { %1217 = vst [vmem:[%s2337_s14 + $0xd0] sm:$0xff] %v1163_v53 }
 0x29e   : > { %v1167_v35 = vpop.f32.mrf.mxu1 }
 0x29f   : > { %v1168_v36 = vadd.f32 %v2332_v49, %v1167_v35 }
 0x2a0   : > { %v1169_v39 = vpop.f32.mrf.mxu1 }
 0x2a1   : > { %1218 = vst [vmem:[%s2337_s14 + $0xd8] sm:$0xff] %v1168_v36 }
 0x2a2   : > { %v1172_v11 = vpop.f32.mrf.mxu1 }
 0x2a3   : > { %v1173_v40 = vadd.f32 %v2332_v49, %v1172_v11 }
 0x2a4   : > { %v1174_v42 = vpop.f32.mrf.mxu1 }
 0x2a5   : > { %1219 = vst [vmem:[%s2337_s14 + $0xe0] sm:$0xff] %v1173_v40 }
 0x2a6   : > { %v1177_v37 = vpop.f32.mrf.mxu1 }
 0x2a7   : > { %v1178_v14 = vadd.f32 %v2332_v49, %v1177_v37 }
 0x2a8   : > { %v1179_v48 = vpop.f32.mrf.mxu1 }
 0x2a9   : > { %1220 = vst [vmem:[%s2337_s14 + $0xe8] sm:$0xff] %v1178_v14 }
 0x2aa   : > { %v1182_v21 = vpop.f32.mrf.mxu1 }
 0x2ab   : > { %v1183_v51 = vadd.f32 %v2332_v49, %v1182_v21 }
 0x2ac   : > { %v1184_v4 = vpop.f32.mrf.mxu1 }
 0x2ad   : > { %1221 = vst [vmem:[%s2337_s14 + $0xf0] sm:$0xff] %v1183_v51 }
 0x2ae   : > { %v1187_v7 = vpop.f32.mrf.mxu1 }
 0x2af   : > { %v1188_v6 = vadd.f32 %v2332_v49, %v1187_v7 }
 0x2b0   : > { %v1189_v61 = vpop.f32.mrf.mxu1 }
 0x2b1   : > { %1222 = vst [vmem:[%s2337_s14 + $0xf8] sm:$0xff] %v1188_v6 }
 0x2b2   : > { %1740 = shalt.err (!%p1737_p3)
}
 0x2b3   : > { %s1741_s15 = scalar_lea.hbm %s2405_s13, 4096  ;;  %s1745_s9 = scalar_lea.hbm %s2457_s5, 8192 }
 0x2b4   : > { %p1742_p11 = scmp.ne.s32.totalorder %s2405_s13, %s1741_s15  ;;  %p1746_p4 = scmp.lt.s32.totalorder %s2405_s13, %s2457_s5 }
 0x2b5   : > { %p1747_p6 = scmp.lt.s32.totalorder %s1745_s9, %s1741_s15 }
 0x2b6   : > { %p1743_p9 = pnand %p1742_p11, %p2474_p2 }
 0x2b7   : > { %p1748_p8 = por %p1747_p6, %p1746_p4 }
 0x2b8   : > { %p1744_p1 = pneg %p1743_p9 }
 0x2ba   : > { %p1749_p10 = pnand %p1748_p8, %p1744_p1 }
 0x2bc   : > { %1752 = shalt.err (!%p1749_p10)
}
 0x2bd   : > { %s1805_s16 = smov 128   ;;  %s1806_s11 = smov 8  }
 0x2be   : > { %1456 = dma.vmem_to_hbm [thread:$0]  (%p2474_p2), %s2407_s10, 4096, %s2405_s13, %s1224_s27, %s1805_s16, %s1805_s16, %s1806_s11  }
 0x2bf PF: > { %s1252_s29 = sand.u32 1, %s1783_s18   ;;  %p2475_p7 = scmp.ne.s32.totalorder %s2464_s25, 0 }
 0x2c0   : > { %p2476_p12 = scmp.ge.s32.totalorder %s1795_s21, 2  ;;  %s1253_s22 = scalar_lea.sflag [#allocation4], %s1252_s29 }
 0x2c2   : > { %p1470_p13 = pnand %p2476_p12, %p2475_p7 }
 0x2c4   : > { %p1471_p0 = pneg %p1470_p13 }
 0x2c6   : > { %1778 = dma.done.wait (%p1471_p0), %s1253_s22, 4096  }
 0x2c7   : > { %1780 = vsyncadd (%p1471_p0), %s1253_s22, 4294963200  ;;  %p19_p5 = scmp.ge.s32.totalorder %s1912_s17, 4   ;;  %s2477_s18 = smov %s1787_s19 }
 0x2c8   : > { %s2478_s19 = smov %s1791_s20  ;;  %s2479_s20 = smov %s1921_s28 }
 0x2c9   : > { %s2480_s21 = smov %s1912_s17  ;;  %21 = sbr.rel (!%p19_p5) target bundleno = 6 (0x6), region = 93 }
 0x2ce   :  { %1258 = vsyncpa [#allocation3], 1 }
 0x2cf   :  { %1260 = vsyncpa [#allocation3 + $0x1], 1 }
 0x2d0   :  { %1261 = vsyncpa [#allocation6], 1 }
 0x2d1   :  { %1262 = vsyncpa [#allocation4], 1 }
 0x2d2   :  { %1264 = vsyncpa [#allocation4 + $0x1], 1 }

</bundles_post_ra>
